<compile_context>
chip_gen: v6e
topology: v6e:2x2x1
jax: 0.10.0
libtpu: 0.0.40
codegen_flags: <defaults>
</compile_context>

<pallas_src>
import functools

import jax
import jax.numpy as jnp
from jax import lax
from jax.experimental import pallas as pl
from jax.experimental.pallas import tpu as pltpu

LANE = 128  # TPU lane width: last dims padded to a multiple of this.


def _round_up(x, m):
    return ((x + m - 1) // m) * m


def _vmem_capacity_bytes():
    """Physical VMEM per core (generation-aware); conservative fallback."""
    try:
        info = pltpu.get_tpu_info()
        for attr in ("vmem_capacity_bytes", "vmem_bytes", "vmem_size_bytes"):
            cap = getattr(info, attr, None)
            if cap:
                return int(cap)
    except Exception:
        pass
    return 64 * 1024 * 1024  # v7x physical VMEM (smallest current generation)


def _prop_vmem_bytes(n_pad, hid_p, tile, n_row, depth, resident):
    """Rough per-core VMEM footprint of the propagation pass."""
    hbuf = 2 * n_pad * hid_p * 2                      # resident bf16 h carry
    acc = tile * hid_p * 4                            # f32 row accumulator
    if resident:
        a = 2 * (n_row * n_row) * tile * tile * 2     # assume double-buffered
    else:
        a = depth * tile * tile * 2                   # streamed A tiles
    io = 2 * tile * hid_p * (4 + 2 + 4)               # h0f + h0b + out blocks
    return hbuf + acc + a + io + (1 << 20)            # + slack


def _plan_prop(n, hid_p, tile_req, budget):
    """Pick the largest A tile that fits the budget; decide A residency."""
    tile = max(LANE, _round_up(min(tile_req, _round_up(n, LANE)), LANE))
    while True:
        n_pad = _round_up(n, tile)
        n_row = n_pad // tile
        depth = 2 if tile >= 1024 else 3
        if (_prop_vmem_bytes(n_pad, hid_p, tile, n_row, depth, False) <= budget
                or tile <= LANE):
            break
        tile -= LANE
    resident = _prop_vmem_bytes(n_pad, hid_p, tile, n_row, depth, True) <= budget
    return tile, n_pad, n_row, depth, resident


# ---------------------------------------------------------------------------
# Pass 1: initial MLP  h0 = relu(x @ W1 + b1) @ W2 + b2     (row-parallel)
# bf16 matmul operands, f32 accumulation; emits h0 in f32 (teleport anchor)
# and bf16 (k==0 propagation operand).
# ---------------------------------------------------------------------------
def _mlp_kernel(x_ref, w1_ref, b1_ref, w2_ref, b2_ref, h0f_ref, h0b_ref):
    h = jnp.dot(x_ref[...], w1_ref[...], preferred_element_type=jnp.float32)
    h = jnp.maximum(h + b1_ref[...], 0.0)
    h0 = jnp.dot(h.astype(jnp.bfloat16), w2_ref[...],
                 preferred_element_type=jnp.float32) + b2_ref[...]
    h0f_ref[...] = h0
    h0b_ref[...] = h0.astype(jnp.bfloat16)


# ---------------------------------------------------------------------------
# Pass 2: K-step APPNP propagation.
#   grid = (K, row_tiles, col_tiles), all "arbitrary" (sequential carry).
#   A is blocked (n_blocks, tile, tile) bf16: either streamed one block per
#   grid step or kept whole-resident in VMEM (constant index -> loaded once).
#   h stays resident in a bf16 VMEM double buffer carried across k; the
#   accumulator and the teleport term are f32.  (1-alpha) is folded into A.
# ---------------------------------------------------------------------------
def _prop_kernel(h0f_ref, h0b_ref, a_ref, o_ref, hbuf_ref, acc_ref, *,
                 K, alpha, tile):
    k = pl.program_id(0)
    i = pl.program_id(1)
    j = pl.program_id(2)
    n_col = pl.num_programs(2)

    row0 = pl.multiple_of(i * tile, tile)
    col0 = pl.multiple_of(j * tile, tile)
    read_slot = lax.rem(k + 1, 2)   # slot written during step k-1
    write_slot = lax.rem(k, 2)

    # A tile: whole blocked A resident (3-D ref) or one streamed block (2-D).
    if a_ref.ndim == 3:
        a_tile = a_ref[i * n_col + j]
    else:
        a_tile = a_ref[...]

    # Start of a row tile: accumulator = loop-invariant teleport term alpha*h0
    # (f32; the (1-alpha) factor lives in A).
    @pl.when(j == 0)
    def _init_row():
        acc_ref[...] = alpha * h0f_ref[...]

    # k == 0: column operand comes straight from the streamed bf16 h0.
    @pl.when(k == 0)
    def _mm_first():
        acc_ref[...] += jnp.dot(a_tile, h0b_ref[...],
                                preferred_element_type=jnp.float32)

    # k > 0: column operand comes from the resident bf16 h double buffer.
    @pl.when(k > 0)
    def _mm_rest():
        h_cols = hbuf_ref[read_slot, pl.ds(col0, tile), :]
        acc_ref[...] += jnp.dot(a_tile, h_cols,
                                preferred_element_type=jnp.float32)

    last_col = j == n_col - 1

    # End of a row tile (not last step): publish new h rows for step k+1.
    @pl.when(last_col & (k < K - 1))
    def _publish():
        hbuf_ref[write_slot, pl.ds(row0, tile), :] = (
            acc_ref[...].astype(hbuf_ref.dtype))

    # End of a row tile (last step): emit the propagated features (f32).
    # The output index_map pins the block to 0 for k < K-1, so only these
    # writes are ever DMAed back to HBM (no garbage writebacks).
    @pl.when(last_col & (k == K - 1))
    def _emit():
        o_ref[...] = acc_ref[...]


# ---------------------------------------------------------------------------
# Pass 3: final Linear(hidden -> out)                       (row-parallel)
# ---------------------------------------------------------------------------
def _final_kernel(h_ref, w3_ref, b3_ref, o_ref):
    o_ref[...] = jnp.dot(h_ref[...], w3_ref[...],
                         preferred_element_type=jnp.float32) + b3_ref[...]


def _make_a_spec(tile, n_row, resident, depth):
    if resident:
        # Constant block index -> loaded into VMEM once, reused for all steps.
        return pl.BlockSpec((n_row * n_row, tile, tile),
                            lambda k, i, j: (0, 0, 0))
    idx = lambda k, i, j: (i * n_row + j, 0, 0)
    try:
        return pl.BlockSpec((None, tile, tile), idx,
                            pipeline_mode=pl.Buffered(depth))
    except TypeError:  # older BlockSpec signature without pipeline_mode
        return pl.BlockSpec((None, tile, tile), idx)


def appnp_forward(x, a_hat, params, *, K, alpha, tile=None, a_resident=None):
    """x: [N, in_c] f32, a_hat: dense gcn_norm adjacency [N, N] f32."""
    assert K >= 1
    w1, b1, w2, b2, w3, b3 = params
    n, in_c = x.shape
    hid = w1.shape[1]
    out_c = w3.shape[1]

    in_p = _round_up(in_c, LANE)
    hid_p = _round_up(hid, LANE)
    out_p = _round_up(out_c, LANE)

    # Generation-aware VMEM budget / explicit scoped-VMEM limit.
    budget = int(_vmem_capacity_bytes() * 0.75)
    tile_req = tile if tile is not None else 1024
    tile, n_pad, n_row, depth, auto_res = _plan_prop(n, hid_p, tile_req, budget)
    resident = auto_res if a_resident is None else bool(a_resident)
    vmem_limit = budget

    f32, bf16 = jnp.float32, jnp.bfloat16

    # ---- plain-JAX glue: zero-pad to lane-dense shapes, bf16 matmul operands.
    xp = jnp.zeros((n_pad, in_p), bf16).at[:n, :in_c].set(x.astype(bf16))
    w1p = jnp.zeros((in_p, hid_p), bf16).at[:in_c, :hid].set(w1.astype(bf16))
    b1p = jnp.zeros((1, hid_p), f32).at[:, :hid].set(
        jnp.asarray(b1, f32).reshape(1, -1))
    w2p = jnp.zeros((hid_p, hid_p), bf16).at[:hid, :hid].set(w2.astype(bf16))
    b2p = jnp.zeros((1, hid_p), f32).at[:, :hid].set(
        jnp.asarray(b2, f32).reshape(1, -1))
    w3p = jnp.zeros((hid_p, out_p), f32).at[:hid, :out_c].set(w3)
    b3p = jnp.zeros((1, out_p), f32).at[:, :out_c].set(
        jnp.asarray(b3, f32).reshape(1, -1))

    # (1-alpha) folded into A; bf16 halves the dominant K*N^2 HBM stream.
    # Pre-block into contiguous (n_blocks, tile, tile) bursts.
    a_pad = jnp.zeros((n_pad, n_pad), f32).at[:n, :n].set(a_hat) * (1.0 - alpha)
    ab = (a_pad.astype(bf16)
          .reshape(n_row, tile, n_row, tile)
          .transpose(0, 2, 1, 3)
          .reshape(n_row * n_row, tile, tile))

    # ---- pass 1: row-parallel MLP (weights whole-resident) --------------------
    h0_f32, h0_bf16 = pl.pallas_call(
        _mlp_kernel,
        out_shape=(jax.ShapeDtypeStruct((n_pad, hid_p), f32),
                   jax.ShapeDtypeStruct((n_pad, hid_p), bf16)),
        grid_spec=pltpu.PrefetchScalarGridSpec(
            num_scalar_prefetch=0,
            grid=(n_pad // tile,),
            in_specs=[
                pl.BlockSpec((tile, in_p), lambda i: (i, 0)),
                pl.BlockSpec((in_p, hid_p), lambda i: (0, 0)),
                pl.BlockSpec((1, hid_p), lambda i: (0, 0)),
                pl.BlockSpec((hid_p, hid_p), lambda i: (0, 0)),
                pl.BlockSpec((1, hid_p), lambda i: (0, 0)),
            ],
            out_specs=[pl.BlockSpec((tile, hid_p), lambda i: (i, 0)),
                       pl.BlockSpec((tile, hid_p), lambda i: (i, 0))],
        ),
        compiler_params=pltpu.CompilerParams(
            dimension_semantics=("parallel",), vmem_limit_bytes=vmem_limit),
    )(xp, w1p, b1p, w2p, b2p)

    # ---- pass 2: APPNP propagation ---------------------------------------------
    # All axes "arbitrary": hbuf/acc scratch carry requires strictly sequential
    # execution with j innermost.
    # h0 bf16 column operand: only k == 0 consumes it; clamp its block index to
    # 0 for k > 0 so it is not re-fetched.  Output block index is clamped to 0
    # for k < K-1 so only final, kernel-written blocks are DMAed to HBM.
    out_idx = lambda k, i, j: (i * jnp.maximum(k - (K - 2), 0), 0)
    h0b_idx = lambda k, i, j: (j * (1 - jnp.minimum(k, 1)), 0)

    h_prop = pl.pallas_call(
        functools.partial(_prop_kernel, K=K, alpha=alpha, tile=tile),
        out_shape=jax.ShapeDtypeStruct((n_pad, hid_p), f32),
        grid_spec=pltpu.PrefetchScalarGridSpec(
            num_scalar_prefetch=0,
            grid=(K, n_row, n_row),
            in_specs=[
                pl.BlockSpec((tile, hid_p), lambda k, i, j: (i, 0)),  # h0 f32 rows
                pl.BlockSpec((tile, hid_p), h0b_idx),                 # h0 bf16 cols
                _make_a_spec(tile, n_row, resident, depth),           # A (bf16)
            ],
            out_specs=pl.BlockSpec((tile, hid_p), out_idx),
            scratch_shapes=[
                pltpu.VMEM((2, n_pad, hid_p), bf16),   # h carry (double buffer)
                pltpu.VMEM((tile, hid_p), f32),        # row accumulator
            ],
        ),
        compiler_params=pltpu.CompilerParams(
            dimension_semantics=("arbitrary", "arbitrary", "arbitrary"),
            vmem_limit_bytes=vmem_limit),
    )(h0_f32, h0_bf16, ab)

    # ---- pass 3: final Linear (row-parallel, lane-dense output) ---------------
    out_pad = pl.pallas_call(
        _final_kernel,
        out_shape=jax.ShapeDtypeStruct((n_pad, out_p), f32),
        grid_spec=pltpu.PrefetchScalarGridSpec(
            num_scalar_prefetch=0,
            grid=(n_pad // tile,),
            in_specs=[
                pl.BlockSpec((tile, hid_p), lambda i: (i, 0)),
                pl.BlockSpec((hid_p, out_p), lambda i: (0, 0)),
                pl.BlockSpec((1, out_p), lambda i: (0, 0)),
            ],
            out_specs=pl.BlockSpec((tile, out_p), lambda i: (i, 0)),
        ),
        compiler_params=pltpu.CompilerParams(
            dimension_semantics=("parallel",), vmem_limit_bytes=vmem_limit),
    )(h_prop, w3p, b3p)

    return out_pad[:n, :out_c]


# ---------------------------------------------------------------------------
# Glue / reference / demo
# ---------------------------------------------------------------------------
def glorot(key, shape):
    fan_in, fan_out = shape
    limit = jnp.sqrt(6.0 / (fan_in + fan_out))
    return jax.random.uniform(key, shape, jnp.float32, -limit, limit)


def build_gcn_adj(edge_index, num_nodes):
    """Dense symmetrically-normalized adjacency with self-loops (gcn_norm)."""
    src, dst = edge_index
    a = jnp.zeros((num_nodes, num_nodes), jnp.float32)
    a = a.at[src, dst].set(1.0)
    a = jnp.maximum(a, a.T)                                           # undirected
    a = a.at[jnp.arange(num_nodes), jnp.arange(num_nodes)].set(1.0)   # self-loops
    deg = a.sum(axis=1)
    dinv = 1.0 / jnp.sqrt(jnp.maximum(deg, 1e-12))
    return dinv[:, None] * a * dinv[None, :]


def appnp_reference(x, a_hat, params, *, K, alpha):
    w1, b1, w2, b2, w3, b3 = params
    h = jnp.maximum(x @ w1 + b1, 0.0) @ w2 + b2
    h0 = h
    for _ in range(K):
        h = (1.0 - alpha) * (a_hat @ h) + alpha * h0
    return h @ w3 + b3


if __name__ == "__main__":
    N = 200        # graph nodes (padded to 256 internally -> 2x2 A-block grid)
    IN_C = 16      # in_channels
    HID = 32       # hidden_channels
    OUT_C = 8      # out_channels
    K = 4          # num_layers (propagation steps)
    ALPHA = 0.1
    NUM_EDGES = 800
    TILE = 128     # small tile so the demo exercises the (K, 2, 2) grid path

    key = jax.random.PRNGKey(0)
    k_x, k_e, k1, k2, k3, kb1, kb2, kb3 = jax.random.split(key, 8)

    x = jax.random.normal(k_x, (N, IN_C), jnp.float32)
    edge_index = jax.random.randint(k_e, (2, NUM_EDGES), 0, N)
    a_hat = build_gcn_adj(edge_index, N)

    params = (
        glorot(k1, (IN_C, HID)), 0.1 * jax.random.normal(kb1, (HID,), jnp.float32),
        glorot(k2, (HID, HID)), 0.1 * jax.random.normal(kb2, (HID,), jnp.float32),
        glorot(k3, (HID, OUT_C)), 0.1 * jax.random.normal(kb3, (OUT_C,), jnp.float32),
    )

    ref = appnp_reference(x, a_hat, params, K=K, alpha=ALPHA)

    # Path 1: auto plan -> whole bf16 A resident in VMEM at this size.
    fwd_res = jax.jit(functools.partial(appnp_forward, K=K, alpha=ALPHA, tile=TILE))
    out_res = jax.block_until_ready(fwd_res(x, a_hat, params))

    # Path 2: force the A-streaming (one tile per grid step) pipeline.
    fwd_str = jax.jit(functools.partial(appnp_forward, K=K, alpha=ALPHA, tile=TILE,
                                        a_resident=False))
    out_str = jax.block_until_ready(fwd_str(x, a_hat, params))

    assert out_res.shape == (N, OUT_C) and out_str.shape == (N, OUT_C)
    # bf16 adjacency / bf16 propagated h / bf16 MLP operands (all with f32
    # accumulation) -> loosened tolerance vs. the pure-f32 reference.
    for out in (out_res, out_str):
        err = float(jnp.max(jnp.abs(out - ref)))
        assert jnp.allclose(out, ref, atol=5e-2, rtol=5e-2), err

    print("KERNEL_OK")
</pallas_src>

<mosaic_0001>
module attributes {stable_mosaic.version = 11 : i64} {
  func.func @_mlp_kernel(%arg0: i32, %arg1: memref<128x128xbf16, #tpu.memory_space<vmem>>, %arg2: memref<128x128xbf16, #tpu.memory_space<vmem>>, %arg3: memref<1x128xf32, #tpu.memory_space<vmem>>, %arg4: memref<128x128xbf16, #tpu.memory_space<vmem>>, %arg5: memref<1x128xf32, #tpu.memory_space<vmem>>, %arg6: memref<128x128xf32, #tpu.memory_space<vmem>>, %arg7: memref<128x128xbf16, #tpu.memory_space<vmem>>) attributes {dimension_semantics = [#tpu.dimension_semantics<parallel>], iteration_bounds = array<i64: 2>, scalar_prefetch = 0 : i64, scratch_operands = 0 : i64, tpu.core_type = #tpu.core_type<tc>, window_params = [{transform_indices = @transform_0, window_bounds = array<i64: 128, 128>}, {pipeline_mode = #tpu.pipeline_mode<synchronous>, transform_indices = @transform_1, window_bounds = array<i64: 128, 128>}, {pipeline_mode = #tpu.pipeline_mode<synchronous>, transform_indices = @transform_2, window_bounds = array<i64: 1, 128>}, {pipeline_mode = #tpu.pipeline_mode<synchronous>, transform_indices = @transform_3, window_bounds = array<i64: 128, 128>}, {pipeline_mode = #tpu.pipeline_mode<synchronous>, transform_indices = @transform_4, window_bounds = array<i64: 1, 128>}, {transform_indices = @transform_5, window_bounds = array<i64: 128, 128>}, {transform_indices = @transform_6, window_bounds = array<i64: 128, 128>}]} {
    %c0 = arith.constant 0 : index
    %c0_0 = arith.constant 0 : index
    %0 = vector.load %arg1[%c0, %c0_0] : memref<128x128xbf16, #tpu.memory_space<vmem>>, vector<128x128xbf16>
    %c0_1 = arith.constant 0 : index
    %c0_2 = arith.constant 0 : index
    %1 = vector.load %arg2[%c0_1, %c0_2] : memref<128x128xbf16, #tpu.memory_space<vmem>>, vector<128x128xbf16>
    %cst = arith.constant dense<0.000000e+00> : vector<128x128xf32>
    %2 = tpu.matmul %0, %1, %cst {dimension_numbers = #tpu.dot_dimension_numbers<[1], [0], [0], [1], [0, 0, 1, 1], [], []>} : vector<128x128xbf16>, vector<128x128xbf16>, vector<128x128xf32> -> vector<128x128xf32>
    %c0_3 = arith.constant 0 : index
    %c0_4 = arith.constant 0 : index
    %3 = vector.load %arg3[%c0_3, %c0_4] : memref<1x128xf32, #tpu.memory_space<vmem>>, vector<1x128xf32>
    %4 = vector.broadcast %3 : vector<1x128xf32> to vector<128x128xf32>
    %5 = arith.addf %2, %4 : vector<128x128xf32>
    %cst_5 = arith.constant 0.000000e+00 : f32
    %6 = vector.broadcast %cst_5 : f32 to vector<128x128xf32>
    %7 = arith.maximumf %5, %6 : vector<128x128xf32>
    %8 = arith.truncf %7 : vector<128x128xf32> to vector<128x128xbf16>
    %c0_6 = arith.constant 0 : index
    %c0_7 = arith.constant 0 : index
    %9 = vector.load %arg4[%c0_6, %c0_7] : memref<128x128xbf16, #tpu.memory_space<vmem>>, vector<128x128xbf16>
    %cst_8 = arith.constant dense<0.000000e+00> : vector<128x128xf32>
    %10 = tpu.matmul %8, %9, %cst_8 {dimension_numbers = #tpu.dot_dimension_numbers<[1], [0], [0], [1], [0, 0, 1, 1], [], []>} : vector<128x128xbf16>, vector<128x128xbf16>, vector<128x128xf32> -> vector<128x128xf32>
    %c0_9 = arith.constant 0 : index
    %c0_10 = arith.constant 0 : index
    %11 = vector.load %arg5[%c0_9, %c0_10] : memref<1x128xf32, #tpu.memory_space<vmem>>, vector<1x128xf32>
    %12 = vector.broadcast %11 : vector<1x128xf32> to vector<128x128xf32>
    %13 = arith.addf %10, %12 : vector<128x128xf32>
    %c0_11 = arith.constant 0 : index
    %c0_12 = arith.constant 0 : index
    %14 = vector.load %arg6[%c0_11, %c0_12] : memref<128x128xf32, #tpu.memory_space<vmem>>, vector<128x128xf32>
    tpu.vector_store %arg6[%c0_11, %c0_12], %13 {strides = array<i32>} : memref<128x128xf32, #tpu.memory_space<vmem>>, vector<128x128xf32>,
    %15 = arith.truncf %13 : vector<128x128xf32> to vector<128x128xbf16>
    %c0_13 = arith.constant 0 : index
    %c0_14 = arith.constant 0 : index
    %16 = vector.load %arg7[%c0_13, %c0_14] : memref<128x128xbf16, #tpu.memory_space<vmem>>, vector<128x128xbf16>
    tpu.vector_store %arg7[%c0_13, %c0_14], %15 {strides = array<i32>} : memref<128x128xbf16, #tpu.memory_space<vmem>>, vector<128x128xbf16>,
    return
  }
  func.func @transform_0(%arg0: i32) -> (i32, i32) {
    %c0_i32 = arith.constant 0 : i32
    %c0_i32_0 = arith.constant 0 : i32
    return %arg0, %c0_i32 : i32, i32
  }
  func.func @transform_1(%arg0: i32) -> (i32, i32) {
    %c0_i32 = arith.constant 0 : i32
    %c0_i32_0 = arith.constant 0 : i32
    %c0_i32_1 = arith.constant 0 : i32
    return %c0_i32, %c0_i32_0 : i32, i32
  }
  func.func @transform_2(%arg0: i32) -> (i32, i32) {
    %c0_i32 = arith.constant 0 : i32
    %c0_i32_0 = arith.constant 0 : i32
    %c0_i32_1 = arith.constant 0 : i32
    return %c0_i32, %c0_i32_0 : i32, i32
  }
  func.func @transform_3(%arg0: i32) -> (i32, i32) {
    %c0_i32 = arith.constant 0 : i32
    %c0_i32_0 = arith.constant 0 : i32
    %c0_i32_1 = arith.constant 0 : i32
    return %c0_i32, %c0_i32_0 : i32, i32
  }
  func.func @transform_4(%arg0: i32) -> (i32, i32) {
    %c0_i32 = arith.constant 0 : i32
    %c0_i32_0 = arith.constant 0 : i32
    %c0_i32_1 = arith.constant 0 : i32
    return %c0_i32, %c0_i32_0 : i32, i32
  }
  func.func @transform_5(%arg0: i32) -> (i32, i32) {
    %c0_i32 = arith.constant 0 : i32
    %c0_i32_0 = arith.constant 0 : i32
    return %arg0, %c0_i32 : i32, i32
  }
  func.func @transform_6(%arg0: i32) -> (i32, i32) {
    %c0_i32 = arith.constant 0 : i32
    %c0_i32_0 = arith.constant 0 : i32
    return %arg0, %c0_i32 : i32, i32
  }
}

module attributes {stable_mosaic.version = 11 : i64} {
  func.func @_prop_kernel(%arg0: i32, %arg1: i32, %arg2: i32, %arg3: memref<128x128xf32, #tpu.memory_space<vmem>>, %arg4: memref<128x128xbf16, #tpu.memory_space<vmem>>, %arg5: memref<4x128x128xbf16, #tpu.memory_space<vmem>>, %arg6: memref<128x128xf32, #tpu.memory_space<vmem>>, %arg7: memref<2x256x128xbf16, #tpu.memory_space<vmem>>, %arg8: memref<128x128xf32, #tpu.memory_space<vmem>>) attributes {dimension_semantics = [#tpu.dimension_semantics<arbitrary>, #tpu.dimension_semantics<arbitrary>, #tpu.dimension_semantics<arbitrary>], iteration_bounds = array<i64: 4, 2, 2>, scalar_prefetch = 0 : i64, scratch_operands = 2 : i64, tpu.core_type = #tpu.core_type<tc>, window_params = [{transform_indices = @transform_0, window_bounds = array<i64: 128, 128>}, {transform_indices = @transform_1, window_bounds = array<i64: 128, 128>}, {pipeline_mode = #tpu.pipeline_mode<synchronous>, transform_indices = @transform_2, window_bounds = array<i64: 4, 128, 128>}, {transform_indices = @transform_3, window_bounds = array<i64: 128, 128>}]} {
    %c128_i32 = arith.constant 128 : i32
    %0 = arith.muli %arg1, %c128_i32 : i32
    %1 = tpu.assume_multiple %0, 128 : i32
    %c128_i32_0 = arith.constant 128 : i32
    %2 = arith.muli %arg2, %c128_i32_0 : i32
    %3 = tpu.assume_multiple %2, 128 : i32
    %c1_i32 = arith.constant 1 : i32
    %4 = arith.addi %arg0, %c1_i32 : i32
    %c2_i32 = arith.constant 2 : i32
    %5 = arith.remsi %4, %c2_i32 : i32
    %c2_i32_1 = arith.constant 2 : i32
    %6 = arith.remsi %arg0, %c2_i32_1 : i32
    %c2_i32_2 = arith.constant 2 : i32
    %7 = arith.muli %arg1, %c2_i32_2 : i32
    %8 = arith.addi %7, %arg2 : i32
    %9 = arith.index_cast %8 : i32 to index
    %c0 = arith.constant 0 : index
    %c0_3 = arith.constant 0 : index
    %10 = vector.load %arg5[%9, %c0, %c0_3] : memref<4x128x128xbf16, #tpu.memory_space<vmem>>, vector<1x128x128xbf16>
    %11 = vector.shape_cast %10 : vector<1x128x128xbf16> to vector<128x128xbf16>
    %c0_i32 = arith.constant 0 : i32
    %12 = arith.cmpi eq, %arg2, %c0_i32 : i32
    %13 = arith.extui %12 : i1 to i32
    %c0_i32_4 = arith.constant 0 : i32
    %14 = arith.cmpi ne, %13, %c0_i32_4 : i32
    scf.if %14 {
      %c0_13 = arith.constant 0 : index
      %c0_14 = arith.constant 0 : index
      %30 = vector.load %arg3[%c0_13, %c0_14] : memref<128x128xf32, #tpu.memory_space<vmem>>, vector<128x128xf32>
      %cst = arith.constant 1.000000e-01 : f32
      %31 = vector.broadcast %cst : f32 to vector<128x128xf32>
      %32 = arith.mulf %31, %30 : vector<128x128xf32>
      %c0_15 = arith.constant 0 : index
      %c0_16 = arith.constant 0 : index
      %33 = vector.load %arg8[%c0_15, %c0_16] : memref<128x128xf32, #tpu.memory_space<vmem>>, vector<128x128xf32>
      tpu.vector_store %arg8[%c0_15, %c0_16], %32 {strides = array<i32>} : memref<128x128xf32, #tpu.memory_space<vmem>>, vector<128x128xf32>,
    } else {
    }
    %c0_i32_5 = arith.constant 0 : i32
    %15 = arith.cmpi eq, %arg0, %c0_i32_5 : i32
    %16 = arith.extui %15 : i1 to i32
    %c0_i32_6 = arith.constant 0 : i32
    %17 = arith.cmpi ne, %16, %c0_i32_6 : i32
    scf.if %17 {
      %c0_13 = arith.constant 0 : index
      %c0_14 = arith.constant 0 : index
      %30 = vector.load %arg8[%c0_13, %c0_14] : memref<128x128xf32, #tpu.memory_space<vmem>>, vector<128x128xf32>
      %c0_15 = arith.constant 0 : index
      %c0_16 = arith.constant 0 : index
      %31 = vector.load %arg4[%c0_15, %c0_16] : memref<128x128xbf16, #tpu.memory_space<vmem>>, vector<128x128xbf16>
      %cst = arith.constant dense<0.000000e+00> : vector<128x128xf32>
      %32 = tpu.matmul %11, %31, %cst {dimension_numbers = #tpu.dot_dimension_numbers<[1], [0], [0], [1], [0, 0, 1, 1], [], []>} : vector<128x128xbf16>, vector<128x128xbf16>, vector<128x128xf32> -> vector<128x128xf32>
      %33 = arith.addf %30, %32 : vector<128x128xf32>
      %c0_17 = arith.constant 0 : index
      %c0_18 = arith.constant 0 : index
      %34 = vector.load %arg8[%c0_17, %c0_18] : memref<128x128xf32, #tpu.memory_space<vmem>>, vector<128x128xf32>
      tpu.vector_store %arg8[%c0_17, %c0_18], %33 {strides = array<i32>} : memref<128x128xf32, #tpu.memory_space<vmem>>, vector<128x128xf32>,
    } else {
    }
    %c0_i32_7 = arith.constant 0 : i32
    %18 = arith.cmpi sgt, %arg0, %c0_i32_7 : i32
    %19 = arith.extui %18 : i1 to i32
    %c0_i32_8 = arith.constant 0 : i32
    %20 = arith.cmpi ne, %19, %c0_i32_8 : i32
    scf.if %20 {
      %30 = arith.index_cast %5 : i32 to index
      %31 = arith.index_cast %3 : i32 to index
      %c0_13 = arith.constant 0 : index
      %32 = vector.load %arg7[%30, %31, %c0_13] : memref<2x256x128xbf16, #tpu.memory_space<vmem>>, vector<1x128x128xbf16>
      %33 = vector.shape_cast %32 : vector<1x128x128xbf16> to vector<128x128xbf16>
      %c0_14 = arith.constant 0 : index
      %c0_15 = arith.constant 0 : index
      %34 = vector.load %arg8[%c0_14, %c0_15] : memref<128x128xf32, #tpu.memory_space<vmem>>, vector<128x128xf32>
      %cst = arith.constant dense<0.000000e+00> : vector<128x128xf32>
      %35 = tpu.matmul %11, %33, %cst {dimension_numbers = #tpu.dot_dimension_numbers<[1], [0], [0], [1], [0, 0, 1, 1], [], []>} : vector<128x128xbf16>, vector<128x128xbf16>, vector<128x128xf32> -> vector<128x128xf32>
      %36 = arith.addf %34, %35 : vector<128x128xf32>
      %c0_16 = arith.constant 0 : index
      %c0_17 = arith.constant 0 : index
      %37 = vector.load %arg8[%c0_16, %c0_17] : memref<128x128xf32, #tpu.memory_space<vmem>>, vector<128x128xf32>
      tpu.vector_store %arg8[%c0_16, %c0_17], %36 {strides = array<i32>} : memref<128x128xf32, #tpu.memory_space<vmem>>, vector<128x128xf32>,
    } else {
    }
    %c1_i32_9 = arith.constant 1 : i32
    %21 = arith.cmpi eq, %arg2, %c1_i32_9 : i32
    %c3_i32 = arith.constant 3 : i32
    %22 = arith.cmpi slt, %arg0, %c3_i32 : i32
    %23 = arith.andi %21, %22 : i1
    %24 = arith.extui %23 : i1 to i32
    %c0_i32_10 = arith.constant 0 : i32
    %25 = arith.cmpi ne, %24, %c0_i32_10 : i32
    scf.if %25 {
      %c0_13 = arith.constant 0 : index
      %c0_14 = arith.constant 0 : index
      %30 = vector.load %arg8[%c0_13, %c0_14] : memref<128x128xf32, #tpu.memory_space<vmem>>, vector<128x128xf32>
      %31 = arith.truncf %30 : vector<128x128xf32> to vector<128x128xbf16>
      %32 = arith.index_cast %6 : i32 to index
      %33 = arith.index_cast %1 : i32 to index
      %c0_15 = arith.constant 0 : index
      %34 = vector.load %arg7[%32, %33, %c0_15] : memref<2x256x128xbf16, #tpu.memory_space<vmem>>, vector<1x128x128xbf16>
      %35 = vector.shape_cast %34 : vector<1x128x128xbf16> to vector<128x128xbf16>
      %36 = vector.shape_cast %31 : vector<128x128xbf16> to vector<1x128x128xbf16>
      tpu.vector_store %arg7[%32, %33, %c0_15], %36 {strides = array<i32>} : memref<2x256x128xbf16, #tpu.memory_space<vmem>>, vector<1x128x128xbf16>,
    } else {
    }
    %c3_i32_11 = arith.constant 3 : i32
    %26 = arith.cmpi eq, %arg0, %c3_i32_11 : i32
    %27 = arith.andi %21, %26 : i1
    %28 = arith.extui %27 : i1 to i32
    %c0_i32_12 = arith.constant 0 : i32
    %29 = arith.cmpi ne, %28, %c0_i32_12 : i32
    scf.if %29 {
      %c0_13 = arith.constant 0 : index
      %c0_14 = arith.constant 0 : index
      %30 = vector.load %arg8[%c0_13, %c0_14] : memref<128x128xf32, #tpu.memory_space<vmem>>, vector<128x128xf32>
      %c0_15 = arith.constant 0 : index
      %c0_16 = arith.constant 0 : index
      %31 = vector.load %arg6[%c0_15, %c0_16] : memref<128x128xf32, #tpu.memory_space<vmem>>, vector<128x128xf32>
      tpu.vector_store %arg6[%c0_15, %c0_16], %30 {strides = array<i32>} : memref<128x128xf32, #tpu.memory_space<vmem>>, vector<128x128xf32>,
    } else {
    }
    return
  }
  func.func @transform_0(%arg0: i32, %arg1: i32, %arg2: i32) -> (i32, i32) {
    %c0_i32 = arith.constant 0 : i32
    %c0_i32_0 = arith.constant 0 : i32
    return %arg1, %c0_i32 : i32, i32
  }
  func.func @transform_1(%arg0: i32, %arg1: i32, %arg2: i32) -> (i32, i32) {
    %c1_i32 = arith.constant 1 : i32
    %0 = arith.minsi %arg0, %c1_i32 : i32
    %c1_i32_0 = arith.constant 1 : i32
    %1 = arith.subi %c1_i32_0, %0 : i32
    %2 = arith.muli %arg2, %1 : i32
    %c0_i32 = arith.constant 0 : i32
    %c0_i32_1 = arith.constant 0 : i32
    return %2, %c0_i32 : i32, i32
  }
  func.func @transform_2(%arg0: i32, %arg1: i32, %arg2: i32) -> (i32, i32, i32) {
    %c0_i32 = arith.constant 0 : i32
    %c0_i32_0 = arith.constant 0 : i32
    %c0_i32_1 = arith.constant 0 : i32
    %c0_i32_2 = arith.constant 0 : i32
    return %c0_i32, %c0_i32_0, %c0_i32_1 : i32, i32, i32
  }
  func.func @transform_3(%arg0: i32, %arg1: i32, %arg2: i32) -> (i32, i32) {
    %c2_i32 = arith.constant 2 : i32
    %0 = arith.subi %arg0, %c2_i32 : i32
    %c0_i32 = arith.constant 0 : i32
    %1 = arith.maxsi %0, %c0_i32 : i32
    %2 = arith.muli %arg1, %1 : i32
    %c0_i32_0 = arith.constant 0 : i32
    %c0_i32_1 = arith.constant 0 : i32
    return %2, %c0_i32_0 : i32, i32
  }
}

module attributes {stable_mosaic.version = 11 : i64} {
  func.func @_final_kernel(%arg0: i32, %arg1: memref<128x128xf32, #tpu.memory_space<vmem>>, %arg2: memref<128x128xf32, #tpu.memory_space<vmem>>, %arg3: memref<1x128xf32, #tpu.memory_space<vmem>>, %arg4: memref<128x128xf32, #tpu.memory_space<vmem>>) attributes {dimension_semantics = [#tpu.dimension_semantics<parallel>], iteration_bounds = array<i64: 2>, scalar_prefetch = 0 : i64, scratch_operands = 0 : i64, tpu.core_type = #tpu.core_type<tc>, window_params = [{transform_indices = @transform_0, window_bounds = array<i64: 128, 128>}, {pipeline_mode = #tpu.pipeline_mode<synchronous>, transform_indices = @transform_1, window_bounds = array<i64: 128, 128>}, {pipeline_mode = #tpu.pipeline_mode<synchronous>, transform_indices = @transform_2, window_bounds = array<i64: 1, 128>}, {transform_indices = @transform_3, window_bounds = array<i64: 128, 128>}]} {
    %c0 = arith.constant 0 : index
    %c0_0 = arith.constant 0 : index
    %0 = vector.load %arg1[%c0, %c0_0] : memref<128x128xf32, #tpu.memory_space<vmem>>, vector<128x128xf32>
    %c0_1 = arith.constant 0 : index
    %c0_2 = arith.constant 0 : index
    %1 = vector.load %arg2[%c0_1, %c0_2] : memref<128x128xf32, #tpu.memory_space<vmem>>, vector<128x128xf32>
    %cst = arith.constant dense<0.000000e+00> : vector<128x128xf32>
    %2 = tpu.matmul %0, %1, %cst {dimension_numbers = #tpu.dot_dimension_numbers<[1], [0], [0], [1], [0, 0, 1, 1], [], []>} : vector<128x128xf32>, vector<128x128xf32>, vector<128x128xf32> -> vector<128x128xf32>
    %c0_3 = arith.constant 0 : index
    %c0_4 = arith.constant 0 : index
    %3 = vector.load %arg3[%c0_3, %c0_4] : memref<1x128xf32, #tpu.memory_space<vmem>>, vector<1x128xf32>
    %4 = vector.broadcast %3 : vector<1x128xf32> to vector<128x128xf32>
    %5 = arith.addf %2, %4 : vector<128x128xf32>
    %c0_5 = arith.constant 0 : index
    %c0_6 = arith.constant 0 : index
    %6 = vector.load %arg4[%c0_5, %c0_6] : memref<128x128xf32, #tpu.memory_space<vmem>>, vector<128x128xf32>
    tpu.vector_store %arg4[%c0_5, %c0_6], %5 {strides = array<i32>} : memref<128x128xf32, #tpu.memory_space<vmem>>, vector<128x128xf32>,
    return
  }
  func.func @transform_0(%arg0: i32) -> (i32, i32) {
    %c0_i32 = arith.constant 0 : i32
    %c0_i32_0 = arith.constant 0 : i32
    return %arg0, %c0_i32 : i32, i32
  }
  func.func @transform_1(%arg0: i32) -> (i32, i32) {
    %c0_i32 = arith.constant 0 : i32
    %c0_i32_0 = arith.constant 0 : i32
    %c0_i32_1 = arith.constant 0 : i32
    return %c0_i32, %c0_i32_0 : i32, i32
  }
  func.func @transform_2(%arg0: i32) -> (i32, i32) {
    %c0_i32 = arith.constant 0 : i32
    %c0_i32_0 = arith.constant 0 : i32
    %c0_i32_1 = arith.constant 0 : i32
    return %c0_i32, %c0_i32_0 : i32, i32
  }
  func.func @transform_3(%arg0: i32) -> (i32, i32) {
    %c0_i32 = arith.constant 0 : i32
    %c0_i32_0 = arith.constant 0 : i32
    return %arg0, %c0_i32 : i32, i32
  }
}

</mosaic_0001>

<bundles_post_ra>
// kernel: appnp_forward.3
= control target key start
LH: loop header
LB: loop body
LE: loop exit
PB: predicated region body
PF: predicated region fallthrough
CT: control target
= control target key end

     0   :  { %s1169_s21 = smov 0   ;;  %s1289_s0 = inlined_call_operand.vmem [shape: bf16[256,128], index: 0, kind: input, shape index: {}]   ;;  %s1290_s1 = inlined_call_operand.vmem [shape: bf16[128,128], index: 1, kind: input, shape index: {}]   ;;  %s1291_s2 = inlined_call_operand.vmem [shape: f32[1,128], index: 2, kind: input, shape index: {}]   ;;  %s1292_s3 = inlined_call_operand.vmem [shape: bf16[128,128], index: 3, kind: input, shape index: {}]   ;;  %s1293_s4 = inlined_call_operand.vmem [shape: f32[1,128], index: 4, kind: input, shape index: {}]   ;;  %s1294_s5 = inlined_call_operand.vmem [shape: f32[256,128], index: 5, kind: output, shape index: {0}]   ;;  %s1295_s6 = inlined_call_operand.vmem [shape: bf16[256,128], index: 6, kind: output, shape index: {1}]  }
   0x1 LB: > { %s880_s22 = sadd.s32 4294967295, %s1132_s21   ;;  %p884_p0 = scmp.ge.s32.totalorder %s1132_s21, 1  ;;  %s1132_s21 = sphi %s1169_s21, %s17_s21  }
   0x2   : > { %p216_p1 = scmp.lt.s32.totalorder %s1132_s21, 3 }
   0x4   : > { %p217_p2 = pnand %p884_p0, %p216_p1 }
   0x5   : > { %s885_s25 = sshll.u32 (!%p217_p2), %s880_s22, 4 }
   0x6   : > { %220 = sbr.rel (%p217_p2) target bundleno = 478 (0x1de), region = 40  ;;  %p252_p3 = scmp.lt.s32.totalorder (!%p217_p2), %s885_s25, 31 }
   0xb   : > { %v1102_v0 = vld [vmem:[%s1290_s1 + $0x38] sm:$0xff]   ;;  %v1103_v1 = vld [vmem:[%s1290_s1 + $0x30] sm:$0xff]   ;;  %s1297_s25 = smov (!%p252_p3, %s885_s25), 31  ;;  %v1104_v2 = vld [vmem:[%s1290_s1 + $0x28] sm:$0xff]  }
   0xc   : > { %1030 = vmatprep.subr.bf16.mxu0 %v1102_v0  ;;  %s886_s30 = sshll.u32 %s1297_s25, 2  ;;  %v1105_v3 = vld [vmem:[%s1290_s1 + $0x20] sm:$0xff]   ;;  %v1106_v5 = vld [vmem:[%s1290_s1 + $0x18] sm:$0xff]   ;;  %v1107_v6 = vld [vmem:[%s1290_s1 + $0x10] sm:$0xff]   ;;  %s888_s17 = sshll.u32 %s1297_s25, 3 }
   0xd   : > { %1031 = vmatpush3.bf16.msra.mxu0 %v1102_v0  ;;  %s1194_s9 = scalar_lea.vmem %s1289_s0, %s886_s30  ;;  %v1118_v7 = vld [vmem:[%s1292_s3 + $0x38] sm:$0xff]   ;;  %v1119_v8 = vld [vmem:[%s1292_s3 + $0x30] sm:$0xff]   ;;  %v1108_v9 = vld [vmem:[%s1290_s1 + $0x8] sm:$0xff]   ;;  %s1253_s23 = scalar_lea.vmem %s1294_s5, %s888_s17 }
   0xe   : > { %1032 = vmatprep.subr.bf16.mxu0 %v1103_v1  ;;  %v1110_v4 = vld [vmem:[%s1194_s9] sm:$0xff]   ;;  %1062 = vmatprep.subr.bf16.mxu1 %v1118_v7  ;;  %v1120_v10 = vld [vmem:[%s1292_s3 + $0x28] sm:$0xff]   ;;  %v1122_v13 = vld [vmem:[%s1292_s3 + $0x18] sm:$0xff]   ;;  %s1262_s27 = scalar_lea.vmem %s1295_s6, %s886_s30 }
   0xf   : > { %1046 = vmatprep.mubr.bf16.mxu0 %v1110_v4  ;;  %1063 = vmatpush3.bf16.msra.mxu1 %v1118_v7  ;;  %v1109_v11 = vld [vmem:[%s1290_s1] sm:$0xff]   ;;  %v1111_v14 = vld [vmem:[%s1194_s9 + $0x8] sm:$0xff]   ;;  %v1112_v15 = vld [vmem:[%s1194_s9 + $0x10] sm:$0xff]  }
  0x10   : > { %1064 = vmatprep.subr.bf16.mxu1 %v1119_v8  ;;  %v1121_v12 = vld [vmem:[%s1292_s3 + $0x20] sm:$0xff]   ;;  %v1113_v16 = vld [vmem:[%s1194_s9 + $0x18] sm:$0xff]   ;;  %v1115_v18 = vld [vmem:[%s1194_s9 + $0x28] sm:$0xff]  }
  0x11   : > { %1033 = vmatpush3.bf16.msra.mxu0 %v1103_v1  ;;  %v1114_v17 = vld [vmem:[%s1194_s9 + $0x20] sm:$0xff]   ;;  %v1116_v19 = vld [vmem:[%s1194_s9 + $0x30] sm:$0xff]   ;;  %v1117_v20 = vld [vmem:[%s1194_s9 + $0x38] sm:$0xff]  }
  0x12   : > { %1034 = vmatprep.subr.bf16.mxu0 %v1104_v2  ;;  %v1123_v21 = vld [vmem:[%s1292_s3 + $0x10] sm:$0xff]   ;;  %v1124_v22 = vld [vmem:[%s1292_s3 + $0x8] sm:$0xff]   ;;  %v1125_v23 = vld [vmem:[%s1292_s3] sm:$0xff]  }
  0x13   : > { %1065 = vmatpush3.bf16.msra.mxu1 %v1119_v8  ;;  %v891_v26 = vld [vmem:[%s1291_s2] ss:$0 sm:$0xff] }
  0x14   : > { %1066 = vmatprep.subr.bf16.mxu1 %v1120_v10 }
  0x15   : > { %1035 = vmatpush3.bf16.msra.mxu0 %v1104_v2 }
  0x16   : > { %1036 = vmatprep.subr.bf16.mxu0 %v1105_v3 }
  0x17   : > { %1067 = vmatpush3.bf16.msra.mxu1 %v1120_v10 }
  0x18   : > { %1068 = vmatprep.subr.bf16.mxu1 %v1121_v12 }
  0x19   : > { %1037 = vmatpush3.bf16.msra.mxu0 %v1105_v3 }
  0x1a   : > { %1038 = vmatprep.subr.bf16.mxu0 %v1106_v5 }
  0x1b   : > { %1069 = vmatpush3.bf16.msra.mxu1 %v1121_v12 }
  0x1c   : > { %1070 = vmatprep.subr.bf16.mxu1 %v1122_v13 }
  0x1d   : > { %1039 = vmatpush3.bf16.msra.mxu0 %v1106_v5 }
  0x1e   : > { %1040 = vmatprep.subr.bf16.mxu0 %v1107_v6 }
  0x1f   : > { %1071 = vmatpush3.bf16.msra.mxu1 %v1122_v13 }
  0x20   : > { %1072 = vmatprep.subr.bf16.mxu1 %v1123_v21 }
  0x21   : > { %1041 = vmatpush3.bf16.msra.mxu0 %v1107_v6 }
  0x22   : > { %1042 = vmatprep.subr.bf16.mxu0 %v1108_v9 }
  0x23   : > { %1073 = vmatpush3.bf16.msra.mxu1 %v1123_v21 }
  0x24   : > { %1074 = vmatprep.subr.bf16.mxu1 %v1124_v22 }
  0x25   : > { %1043 = vmatpush3.bf16.msra.mxu0 %v1108_v9 }
  0x26   : > { %1044 = vmatprep.subr.bf16.mxu0 %v1109_v11 }
  0x27   : > { %1075 = vmatpush3.bf16.msra.mxu1 %v1124_v22 }
  0x28   : > { %1076 = vmatprep.subr.bf16.mxu1 %v1125_v23 }
  0x29   : > { %1045 = vmatpush3.bf16.msra.mxu0 %v1109_v11 }
  0x2b   : > { %1077 = vmatpush3.bf16.msra.mxu1 %v1125_v23 }
  0x2c   : > { %1047 = vmatmul.mubr.bf16.vlgmr.msra.gmra.mxu0 %v1111_v14 }
  0x2d   : > { %1050 = vmatprep.mubr.bf16.mxu0 %v1112_v15 }
  0x34   : > { %1051 = vmatmul.mubr.bf16.gmra.mxu0 %v1113_v16 }
  0x35   : > { %1054 = vmatprep.mubr.bf16.mxu0 %v1114_v17  ;;  %v908_v17 = vld [vmem:[%s1293_s4] ss:$0 sm:$0xff] }
  0x3c   : > { %1055 = vmatmul.mubr.bf16.gmra.mxu0 %v1115_v18 }
  0x3d   : > { %1058 = vmatprep.mubr.bf16.mxu0 %v1116_v19 }
  0x44   : > { %1059 = vmatmul.mubr.bf16.gmra.mxu0 %v1117_v20 }
  0xec   : > { %v1048_v24 = vpop.f32.mrf.mxu0 }
  0xed   : > { %v448_v30 = vadd.f32 %v1048_v24, %v891_v26 }
  0xee   : > { %v439_v25 = vpop.f32.mrf.mxu0 }
  0xef   : > { %v440_v28 = vadd.f32 %v891_v26, %v439_v25  ;;  %v504_v37 = vmax.f32 %v448_v30, 0.0 }
  0xf0   : > { %v1049_v27 = vpop.f32.mrf.mxu0 }
  0xf1   : > { %v451_v29 = vadd.f32 %v1049_v27, %v891_v26  ;;  %v502_v35 = vmax.f32 %v440_v28, 0.0 }
  0xf2   : > { %v442_v31 = vpop.f32.mrf.mxu0 }
  0xf3   : > { %v443_v32 = vadd.f32 %v891_v26, %v442_v31  ;;  %v505_v33 = vmax.f32 %v451_v29, 0.0 }
  0xf4   : > { %v1052_v34 = vpop.f32.mrf.mxu0 }
  0xf5   : > { %v503_v36 = vmax.f32 %v443_v32, 0.0  ;;  %v519_v40 = vpack.c.bf16 %v505_v33, %v504_v37  ;;  %v464_v44 = vadd.f32 %v1052_v34, %v891_v26 }
  0xf6   : > { %v455_v38 = vpop.f32.mrf.mxu0 }
  0xf7   : > { %v518_v39 = vpack.c.bf16 %v503_v36, %v502_v35  ;;  %v456_v42 = vadd.f32 %v891_v26, %v455_v38  ;;  %v508_v51 = vmax.f32 %v464_v44, 0.0 }
  0xf8   : > { %v1053_v41 = vpop.f32.mrf.mxu0 }
  0xf9   : > { %v467_v43 = vadd.f32 %v1053_v41, %v891_v26  ;;  %1078 = vmatprep.mubr.bf16.mxu1 %v518_v39  ;;  %v506_v49 = vmax.f32 %v456_v42, 0.0 }
  0xfa   : > { %v458_v45 = vpop.f32.mrf.mxu0  ;;  %1079 = vmatmul.mubr.bf16.vlgmr.msra.gmra.mxu1 %v519_v40 }
  0xfb   : > { %v459_v46 = vadd.f32 %v891_v26, %v458_v45  ;;  %v509_v47 = vmax.f32 %v467_v43, 0.0 }
  0xfc   : > { %v1056_v48 = vpop.f32.mrf.mxu0 }
  0xfd   : > { %v507_v50 = vmax.f32 %v459_v46, 0.0  ;;  %v521_v54 = vpack.c.bf16 %v509_v47, %v508_v51  ;;  %v480_v58 = vadd.f32 %v1056_v48, %v891_v26 }
  0xfe   : > { %v471_v52 = vpop.f32.mrf.mxu0 }
  0xff   : > { %v520_v53 = vpack.c.bf16 %v507_v50, %v506_v49  ;;  %v472_v56 = vadd.f32 %v891_v26, %v471_v52  ;;  %v512_v1 = vmax.f32 %v480_v58, 0.0 }
 0x100   : > { %v1057_v55 = vpop.f32.mrf.mxu0 }
 0x101   : > { %v483_v57 = vadd.f32 %v1057_v55, %v891_v26  ;;  %1082 = vmatprep.mubr.bf16.mxu1 %v520_v53  ;;  %v510_v63 = vmax.f32 %v472_v56, 0.0 }
 0x102   : > { %v474_v59 = vpop.f32.mrf.mxu0  ;;  %1083 = vmatmul.mubr.bf16.gmra.mxu1 %v521_v54 }
 0x103   : > { %v475_v60 = vadd.f32 %v891_v26, %v474_v59  ;;  %v513_v61 = vmax.f32 %v483_v57, 0.0 }
 0x104   : > { %v1060_v62 = vpop.f32.mrf.mxu0 }
 0x105   : > { %v511_v0 = vmax.f32 %v475_v60, 0.0  ;;  %v523_v4 = vpack.c.bf16 %v513_v61, %v512_v1  ;;  %v496_v8 = vadd.f32 %v1060_v62, %v891_v26 }
 0x106   : > { %v487_v2 = vpop.f32.mrf.mxu0 }
 0x107   : > { %v522_v3 = vpack.c.bf16 %v511_v0, %v510_v63  ;;  %v488_v6 = vadd.f32 %v891_v26, %v487_v2  ;;  %v516_v14 = vmax.f32 %v496_v8, 0.0 }
 0x108   : > { %v1061_v5 = vpop.f32.mrf.mxu0 }
 0x109   : > { %v499_v7 = vadd.f32 %v1061_v5, %v891_v26  ;;  %1086 = vmatprep.mubr.bf16.mxu1 %v522_v3  ;;  %v514_v12 = vmax.f32 %v488_v6, 0.0 }
 0x10a   : > { %v490_v9 = vpop.f32.mrf.mxu0  ;;  %1087 = vmatmul.mubr.bf16.gmra.mxu1 %v523_v4 }
 0x10b   : > { %v491_v10 = vadd.f32 %v891_v26, %v490_v9  ;;  %v517_v11 = vmax.f32 %v499_v7, 0.0 }
 0x10d   : > { %v515_v13 = vmax.f32 %v491_v10, 0.0  ;;  %v525_v16 = vpack.c.bf16 %v517_v11, %v516_v14 }
 0x10f   : > { %v524_v15 = vpack.c.bf16 %v515_v13, %v514_v12 }
 0x111   : > { %1090 = vmatprep.mubr.bf16.mxu1 %v524_v15 }
 0x112   : > { %1091 = vmatmul.mubr.bf16.gmra.mxu1 %v525_v16 }
 0x1ba   : > { %v1080_v18 = vpop.f32.mrf.mxu1 }
 0x1bb   : > { %v640_v19 = vadd.f32 %v1080_v18, %v908_v17 }
 0x1bc   : > { %v631_v20 = vpop.f32.mrf.mxu1 }
 0x1bd   : > { %696 = vst [vmem:[%s1253_s23 + $0x10] sm:$0xff] %v640_v19  ;;  %v632_v21 = vadd.f32 %v908_v17, %v631_v20 }
 0x1be   : > { %v1081_v22 = vpop.f32.mrf.mxu1 }
 0x1bf   : > { %694 = vst [vmem:[%s1253_s23] sm:$0xff] %v632_v21  ;;  %v643_v23 = vadd.f32 %v1081_v22, %v908_v17 }
 0x1c0   : > { %v634_v24 = vpop.f32.mrf.mxu1 }
 0x1c1   : > { %697 = vst [vmem:[%s1253_s23 + $0x18] sm:$0xff] %v643_v23  ;;  %v959_v25 = vpack.c.bf16 %v643_v23, %v640_v19  ;;  %v635_v26 = vadd.f32 %v908_v17, %v634_v24 }
 0x1c2   : > { %v1084_v27 = vpop.f32.mrf.mxu1 }
 0x1c3   : > { %991 = vst [vmem:[%s1262_s27 + $0x8] sm:$0xff] %v959_v25   ;;  %695 = vst [vmem:[%s1253_s23 + $0x8] sm:$0xff] %v635_v26  ;;  %v954_v28 = vpack.c.bf16 %v635_v26, %v632_v21  ;;  %v656_v29 = vadd.f32 %v1084_v27, %v908_v17 }
 0x1c4   : > { %v647_v30 = vpop.f32.mrf.mxu1 }
 0x1c5   : > { %955 = vst [vmem:[%s1262_s27] sm:$0xff] %v954_v28   ;;  %700 = vst [vmem:[%s1253_s23 + $0x30] sm:$0xff] %v656_v29  ;;  %v648_v31 = vadd.f32 %v908_v17, %v647_v30 }
 0x1c6   : > { %v1085_v32 = vpop.f32.mrf.mxu1 }
 0x1c7   : > { %698 = vst [vmem:[%s1253_s23 + $0x20] sm:$0xff] %v648_v31  ;;  %v659_v33 = vadd.f32 %v1085_v32, %v908_v17 }
 0x1c8   : > { %v650_v34 = vpop.f32.mrf.mxu1 }
 0x1c9   : > { %701 = vst [vmem:[%s1253_s23 + $0x38] sm:$0xff] %v659_v33  ;;  %v969_v35 = vpack.c.bf16 %v659_v33, %v656_v29  ;;  %v651_v36 = vadd.f32 %v908_v17, %v650_v34 }
 0x1ca   : > { %v1088_v37 = vpop.f32.mrf.mxu1 }
 0x1cb   : > { %993 = vst [vmem:[%s1262_s27 + $0x18] sm:$0xff] %v969_v35   ;;  %699 = vst [vmem:[%s1253_s23 + $0x28] sm:$0xff] %v651_v36  ;;  %v964_v38 = vpack.c.bf16 %v651_v36, %v648_v31  ;;  %v672_v39 = vadd.f32 %v1088_v37, %v908_v17 }
 0x1cc   : > { %v663_v40 = vpop.f32.mrf.mxu1 }
 0x1cd   : > { %992 = vst [vmem:[%s1262_s27 + $0x10] sm:$0xff] %v964_v38   ;;  %704 = vst [vmem:[%s1253_s23 + $0x50] sm:$0xff] %v672_v39  ;;  %v664_v41 = vadd.f32 %v908_v17, %v663_v40 }
 0x1ce   : > { %v1089_v42 = vpop.f32.mrf.mxu1 }
 0x1cf   : > { %702 = vst [vmem:[%s1253_s23 + $0x40] sm:$0xff] %v664_v41  ;;  %v675_v43 = vadd.f32 %v1089_v42, %v908_v17 }
 0x1d0   : > { %v666_v44 = vpop.f32.mrf.mxu1 }
 0x1d1   : > { %705 = vst [vmem:[%s1253_s23 + $0x58] sm:$0xff] %v675_v43  ;;  %v979_v45 = vpack.c.bf16 %v675_v43, %v672_v39  ;;  %v667_v46 = vadd.f32 %v908_v17, %v666_v44 }
 0x1d2   : > { %v1092_v47 = vpop.f32.mrf.mxu1 }
 0x1d3   : > { %995 = vst [vmem:[%s1262_s27 + $0x28] sm:$0xff] %v979_v45   ;;  %703 = vst [vmem:[%s1253_s23 + $0x48] sm:$0xff] %v667_v46  ;;  %v974_v48 = vpack.c.bf16 %v667_v46, %v664_v41  ;;  %v688_v49 = vadd.f32 %v1092_v47, %v908_v17 }
 0x1d4   : > { %v679_v50 = vpop.f32.mrf.mxu1 }
 0x1d5   : > { %994 = vst [vmem:[%s1262_s27 + $0x20] sm:$0xff] %v974_v48   ;;  %708 = vst [vmem:[%s1253_s23 + $0x70] sm:$0xff] %v688_v49  ;;  %v680_v51 = vadd.f32 %v908_v17, %v679_v50 }
 0x1d6   : > { %v1093_v52 = vpop.f32.mrf.mxu1 }
 0x1d7   : > { %706 = vst [vmem:[%s1253_s23 + $0x60] sm:$0xff] %v680_v51  ;;  %v691_v53 = vadd.f32 %v1093_v52, %v908_v17 }
 0x1d8   : > { %v682_v54 = vpop.f32.mrf.mxu1 }
 0x1d9   : > { %709 = vst [vmem:[%s1253_s23 + $0x78] sm:$0xff] %v691_v53  ;;  %v989_v55 = vpack.c.bf16 %v691_v53, %v688_v49  ;;  %v683_v56 = vadd.f32 %v908_v17, %v682_v54 }
 0x1db   : > { %997 = vst [vmem:[%s1262_s27 + $0x38] sm:$0xff] %v989_v55   ;;  %707 = vst [vmem:[%s1253_s23 + $0x68] sm:$0xff] %v683_v56  ;;  %v984_v57 = vpack.c.bf16 %v683_v56, %v680_v51 }
 0x1dd   : > { %996 = vst [vmem:[%s1262_s27 + $0x30] sm:$0xff] %v984_v57  }
 0x1de PF: > { %s17_s21 = sadd.s32 1, %s1132_s21  }
 0x1df   : > { %p14_p4 = scmp.ge.s32.totalorder %s17_s21, 4  }
 0x1e1   :  { %16 = sbr.rel (!%p14_p4) target bundleno = 1 (0x1), region = 82 }

// kernel: appnp_forward.5
= control target key start
LH: loop header
LB: loop body
LE: loop exit
PB: predicated region body
PF: predicated region fallthrough
CT: control target
= control target key end

     0   :  { %s598_s12 = smov 0   ;;  %s711_s0 = inlined_call_operand.vmem [shape: f32[256,128], index: 0, kind: input, shape index: {}]   ;;  %s712_s1 = inlined_call_operand.vmem [shape: f32[128,128], index: 1, kind: input, shape index: {}]   ;;  %s713_s2 = inlined_call_operand.vmem [shape: f32[1,128], index: 2, kind: input, shape index: {}]   ;;  %s714_s3 = inlined_call_operand.vmem [shape: f32[256,128], index: 3, kind: output, shape index: {}]  }
   0x1 LB: > { %s430_s13 = sadd.s32 4294967295, %s576_s12   ;;  %p434_p0 = scmp.ge.s32.totalorder %s576_s12, 1  ;;  %s576_s12 = sphi %s598_s12, %s13_s12  }
   0x2   : > { %p138_p1 = scmp.lt.s32.totalorder %s576_s12, 3 }
   0x4   : > { %p139_p2 = pnand %p434_p0, %p138_p1 }
   0x5   : > { %s435_s30 = sshll.u32 (!%p139_p2), %s430_s13, 4 }
   0x6   : > { %142 = sbr.rel (%p139_p2) target bundleno = 255 (0xff), region = 32  ;;  %p163_p3 = scmp.lt.s32.totalorder (!%p139_p2), %s435_s30, 31 }
   0xb   : > { %v205_v0 = vld [vmem:[%s712_s1 + $0x78] sm:$0xff]  ;;  %v204_v1 = vld [vmem:[%s712_s1 + $0x70] sm:$0xff]  ;;  %v203_v2 = vld [vmem:[%s712_s1 + $0x68] sm:$0xff]  ;;  %s716_s30 = smov (!%p163_p3, %s435_s30), 31 }
   0xc   : > { %474 = vmatprep.subr.mxu0 %v205_v0  ;;  %530 = vmatprep.subr.mxu1 %v205_v0  ;;  %v202_v3 = vld [vmem:[%s712_s1 + $0x60] sm:$0xff]  ;;  %v201_v4 = vld [vmem:[%s712_s1 + $0x58] sm:$0xff]  ;;  %v200_v5 = vld [vmem:[%s712_s1 + $0x50] sm:$0xff]  ;;  %s436_s17 = sshll.u32 %s716_s30, 3 }
   0xd   : > { %475 = vmatpush3.msra.mxu0 %v205_v0  ;;  %546 = vmatpush3.msra.mxu1 %v205_v0  ;;  %v199_v6 = vld [vmem:[%s712_s1 + $0x48] sm:$0xff]  ;;  %v198_v7 = vld [vmem:[%s712_s1 + $0x40] sm:$0xff]  ;;  %v197_v8 = vld [vmem:[%s712_s1 + $0x38] sm:$0xff]  ;;  %s661_s22 = scalar_lea.vmem %s711_s0, %s436_s17  ;;  %s690_s29 = scalar_lea.vmem %s714_s3, %s436_s17 }
   0xe   : > { %476 = vmatprep.subr.mxu0 %v204_v1  ;;  %531 = vmatprep.subr.mxu1 %v204_v1  ;;  %v196_v9 = vld [vmem:[%s712_s1 + $0x30] sm:$0xff]  ;;  %v195_v10 = vld [vmem:[%s712_s1 + $0x28] sm:$0xff]  ;;  %v194_v11 = vld [vmem:[%s712_s1 + $0x20] sm:$0xff] }
   0xf   : > { %477 = vmatpush3.msra.mxu0 %v204_v1  ;;  %547 = vmatpush3.msra.mxu1 %v204_v1  ;;  %v193_v12 = vld [vmem:[%s712_s1 + $0x18] sm:$0xff]  ;;  %v192_v13 = vld [vmem:[%s712_s1 + $0x10] sm:$0xff]  ;;  %v191_v14 = vld [vmem:[%s712_s1 + $0x8] sm:$0xff] }
  0x10   : > { %478 = vmatprep.subr.mxu0 %v203_v2  ;;  %532 = vmatprep.subr.mxu1 %v203_v2  ;;  %v190_v15 = vld [vmem:[%s712_s1] sm:$0xff]  ;;  %v175_v18 = vld [vmem:[%s661_s22 + $0x8] sm:$0xff]  ;;  %v176_v20 = vld [vmem:[%s661_s22 + $0x10] sm:$0xff] }
  0x11   : > { %479 = vmatpush3.msra.mxu0 %v203_v2  ;;  %548 = vmatpush3.msra.mxu1 %v203_v2  ;;  %v174_v16 = vld [vmem:[%s661_s22] sm:$0xff]  ;;  %v183_v19 = vld [vmem:[%s661_s22 + $0x48] sm:$0xff]  ;;  %v184_v21 = vld [vmem:[%s661_s22 + $0x50] sm:$0xff] }
  0x12   : > { %480 = vmatprep.subr.mxu0 %v202_v3  ;;  %533 = vmatprep.subr.mxu1 %v202_v3  ;;  %v182_v17 = vld [vmem:[%s661_s22 + $0x40] sm:$0xff]  ;;  %v177_v22 = vld [vmem:[%s661_s22 + $0x18] sm:$0xff]  ;;  %v179_v26 = vld [vmem:[%s661_s22 + $0x28] sm:$0xff] }
  0x13   : > { %481 = vmatpush3.msra.mxu0 %v202_v3  ;;  %549 = vmatpush3.msra.mxu1 %v202_v3  ;;  %v185_v23 = vld [vmem:[%s661_s22 + $0x58] sm:$0xff]  ;;  %v178_v24 = vld [vmem:[%s661_s22 + $0x20] sm:$0xff]  ;;  %v187_v27 = vld [vmem:[%s661_s22 + $0x68] sm:$0xff] }
  0x14   : > { %482 = vmatprep.subr.mxu0 %v201_v4  ;;  %534 = vmatprep.subr.mxu1 %v201_v4  ;;  %v186_v25 = vld [vmem:[%s661_s22 + $0x60] sm:$0xff]  ;;  %v180_v28 = vld [vmem:[%s661_s22 + $0x30] sm:$0xff]  ;;  %v181_v30 = vld [vmem:[%s661_s22 + $0x38] sm:$0xff] }
  0x15   : > { %483 = vmatpush3.msra.mxu0 %v201_v4  ;;  %550 = vmatpush3.msra.mxu1 %v201_v4  ;;  %v188_v29 = vld [vmem:[%s661_s22 + $0x70] sm:$0xff]  ;;  %v189_v31 = vld [vmem:[%s661_s22 + $0x78] sm:$0xff]  ;;  %v439_v32 = vld [vmem:[%s713_s2] ss:$0 sm:$0xff] }
  0x16   : > { %484 = vmatprep.subr.mxu0 %v200_v5  ;;  %535 = vmatprep.subr.mxu1 %v200_v5 }
  0x17   : > { %485 = vmatpush3.msra.mxu0 %v200_v5  ;;  %551 = vmatpush3.msra.mxu1 %v200_v5 }
  0x18   : > { %486 = vmatprep.subr.mxu0 %v199_v6  ;;  %536 = vmatprep.subr.mxu1 %v199_v6 }
  0x19   : > { %487 = vmatpush3.msra.mxu0 %v199_v6  ;;  %552 = vmatpush3.msra.mxu1 %v199_v6 }
  0x1a   : > { %488 = vmatprep.subr.mxu0 %v198_v7  ;;  %537 = vmatprep.subr.mxu1 %v198_v7 }
  0x1b   : > { %489 = vmatpush3.msra.mxu0 %v198_v7  ;;  %553 = vmatpush3.msra.mxu1 %v198_v7 }
  0x1c   : > { %490 = vmatprep.subr.mxu0 %v197_v8  ;;  %538 = vmatprep.subr.mxu1 %v197_v8 }
  0x1d   : > { %491 = vmatpush3.msra.mxu0 %v197_v8  ;;  %554 = vmatpush3.msra.mxu1 %v197_v8 }
  0x1e   : > { %492 = vmatprep.subr.mxu0 %v196_v9  ;;  %539 = vmatprep.subr.mxu1 %v196_v9 }
  0x1f   : > { %493 = vmatpush3.msra.mxu0 %v196_v9  ;;  %555 = vmatpush3.msra.mxu1 %v196_v9 }
  0x20   : > { %494 = vmatprep.subr.mxu0 %v195_v10  ;;  %540 = vmatprep.subr.mxu1 %v195_v10 }
  0x21   : > { %495 = vmatpush3.msra.mxu0 %v195_v10  ;;  %556 = vmatpush3.msra.mxu1 %v195_v10 }
  0x22   : > { %496 = vmatprep.subr.mxu0 %v194_v11  ;;  %541 = vmatprep.subr.mxu1 %v194_v11 }
  0x23   : > { %497 = vmatpush3.msra.mxu0 %v194_v11  ;;  %557 = vmatpush3.msra.mxu1 %v194_v11 }
  0x24   : > { %498 = vmatprep.subr.mxu0 %v193_v12  ;;  %542 = vmatprep.subr.mxu1 %v193_v12 }
  0x25   : > { %499 = vmatpush3.msra.mxu0 %v193_v12  ;;  %558 = vmatpush3.msra.mxu1 %v193_v12 }
  0x26   : > { %500 = vmatprep.subr.mxu0 %v192_v13  ;;  %543 = vmatprep.subr.mxu1 %v192_v13 }
  0x27   : > { %501 = vmatpush3.msra.mxu0 %v192_v13  ;;  %559 = vmatpush3.msra.mxu1 %v192_v13 }
  0x28   : > { %502 = vmatprep.subr.mxu0 %v191_v14  ;;  %544 = vmatprep.subr.mxu1 %v191_v14 }
  0x29   : > { %503 = vmatpush3.msra.mxu0 %v191_v14  ;;  %560 = vmatpush3.msra.mxu1 %v191_v14 }
  0x2a   : > { %504 = vmatprep.subr.mxu0 %v190_v15  ;;  %545 = vmatprep.subr.mxu1 %v190_v15 }
  0x2b   : > { %505 = vmatpush3.msra.mxu0 %v190_v15  ;;  %561 = vmatpush3.msra.mxu1 %v190_v15 }
  0x2c   : > { %506 = vmatprep.mubr.f32.mxu0 %v174_v16  ;;  %518 = vmatprep.mubr.f32.mxu1 %v182_v17 }
  0x2d   : > { %507 = vmatmul.mubr.f32.vlgmr.msra.gmra.mxu0 %v175_v18  ;;  %519 = vmatmul.mubr.f32.vlgmr.msra.gmra.mxu1 %v183_v19 }
  0x2e   : > { %509 = vmatprep.mubr.f32.mxu0 %v176_v20  ;;  %521 = vmatprep.mubr.f32.mxu1 %v184_v21 }
  0x31   : > { %510 = vmatmul.mubr.f32.gmra.mxu0 %v177_v22  ;;  %522 = vmatmul.mubr.f32.gmra.mxu1 %v185_v23 }
  0x32   : > { %512 = vmatprep.mubr.f32.mxu0 %v178_v24  ;;  %524 = vmatprep.mubr.f32.mxu1 %v186_v25 }
  0x35   : > { %513 = vmatmul.mubr.f32.gmra.mxu0 %v179_v26  ;;  %525 = vmatmul.mubr.f32.gmra.mxu1 %v187_v27 }
  0x36   : > { %515 = vmatprep.mubr.f32.mxu0 %v180_v28  ;;  %527 = vmatprep.mubr.f32.mxu1 %v188_v29 }
  0x39   : > { %516 = vmatmul.mubr.f32.gmra.mxu0 %v181_v30  ;;  %528 = vmatmul.mubr.f32.gmra.mxu1 %v189_v31 }
  0xed   : > { %v508_v33 = vpop.f32.mrf.mxu0  ;;  %v520_v34 = vpop.f32.mrf.mxu1 }
  0xee   : > { %v285_v35 = vadd.f32 %v508_v33, %v439_v32  ;;  %v325_v36 = vadd.f32 %v520_v34, %v439_v32 }
  0xef   : > { %v279_v37 = vpop.f32.mrf.mxu0  ;;  %v319_v38 = vpop.f32.mrf.mxu1 }
  0xf0   : > { %359 = vst [vmem:[%s690_s29 + $0x8] sm:$0xff] %v285_v35  ;;  %367 = vst [vmem:[%s690_s29 + $0x48] sm:$0xff] %v325_v36  ;;  %v280_v39 = vadd.f32 %v439_v32, %v279_v37  ;;  %v320_v40 = vadd.f32 %v439_v32, %v319_v38 }
  0xf1   : > { %v511_v41 = vpop.f32.mrf.mxu0  ;;  %v523_v42 = vpop.f32.mrf.mxu1 }
  0xf2   : > { %358 = vst [vmem:[%s690_s29] sm:$0xff] %v280_v39  ;;  %366 = vst [vmem:[%s690_s29 + $0x40] sm:$0xff] %v320_v40  ;;  %v295_v43 = vadd.f32 %v511_v41, %v439_v32  ;;  %v335_v44 = vadd.f32 %v523_v42, %v439_v32 }
  0xf3   : > { %v289_v45 = vpop.f32.mrf.mxu0  ;;  %v329_v46 = vpop.f32.mrf.mxu1 }
  0xf4   : > { %361 = vst [vmem:[%s690_s29 + $0x18] sm:$0xff] %v295_v43  ;;  %369 = vst [vmem:[%s690_s29 + $0x58] sm:$0xff] %v335_v44  ;;  %v290_v47 = vadd.f32 %v439_v32, %v289_v45  ;;  %v330_v48 = vadd.f32 %v439_v32, %v329_v46 }
  0xf5   : > { %v514_v49 = vpop.f32.mrf.mxu0  ;;  %v526_v50 = vpop.f32.mrf.mxu1 }
  0xf6   : > { %360 = vst [vmem:[%s690_s29 + $0x10] sm:$0xff] %v290_v47  ;;  %368 = vst [vmem:[%s690_s29 + $0x50] sm:$0xff] %v330_v48  ;;  %v305_v51 = vadd.f32 %v514_v49, %v439_v32  ;;  %v345_v52 = vadd.f32 %v526_v50, %v439_v32 }
  0xf7   : > { %v299_v53 = vpop.f32.mrf.mxu0  ;;  %v339_v54 = vpop.f32.mrf.mxu1 }
  0xf8   : > { %363 = vst [vmem:[%s690_s29 + $0x28] sm:$0xff] %v305_v51  ;;  %371 = vst [vmem:[%s690_s29 + $0x68] sm:$0xff] %v345_v52  ;;  %v300_v55 = vadd.f32 %v439_v32, %v299_v53  ;;  %v340_v56 = vadd.f32 %v439_v32, %v339_v54 }
  0xf9   : > { %v517_v57 = vpop.f32.mrf.mxu0  ;;  %v529_v58 = vpop.f32.mrf.mxu1 }
  0xfa   : > { %362 = vst [vmem:[%s690_s29 + $0x20] sm:$0xff] %v300_v55  ;;  %370 = vst [vmem:[%s690_s29 + $0x60] sm:$0xff] %v340_v56  ;;  %v315_v59 = vadd.f32 %v517_v57, %v439_v32  ;;  %v355_v60 = vadd.f32 %v529_v58, %v439_v32 }
  0xfb   : > { %v309_v61 = vpop.f32.mrf.mxu0  ;;  %v349_v62 = vpop.f32.mrf.mxu1 }
  0xfc   : > { %365 = vst [vmem:[%s690_s29 + $0x38] sm:$0xff] %v315_v59  ;;  %373 = vst [vmem:[%s690_s29 + $0x78] sm:$0xff] %v355_v60  ;;  %v310_v63 = vadd.f32 %v439_v32, %v309_v61  ;;  %v350_v0 = vadd.f32 %v439_v32, %v349_v62 }
  0xfe   : > { %364 = vst [vmem:[%s690_s29 + $0x30] sm:$0xff] %v310_v63  ;;  %372 = vst [vmem:[%s690_s29 + $0x70] sm:$0xff] %v350_v0 }
  0xff PF: > { %s13_s12 = sadd.s32 1, %s576_s12  }
 0x100   : > { %p10_p4 = scmp.ge.s32.totalorder %s13_s12, 4  }
 0x102   :  { %12 = sbr.rel (!%p10_p4) target bundleno = 1 (0x1), region = 62 }

// kernel: appnp_forward.4
= control target key start
LH: loop header
LB: loop body
LE: loop exit
PB: predicated region body
PF: predicated region fallthrough
CT: control target
= control target key end

     0   :  { %s1553_s12 = smov 0   ;;  %s1555_s13 = smov 0   ;;  %s1789_s0 = inlined_call_operand.vmem [shape: f32[256,128], index: 0, kind: input, shape index: {}]   ;;  %s1790_s1 = inlined_call_operand.vmem [shape: bf16[256,128], index: 1, kind: input, shape index: {}]   ;;  %s1791_s2 = inlined_call_operand.vmem [shape: bf16[4,128,128], index: 2, kind: input, shape index: {}]   ;;  %s1792_s3 = inlined_call_operand.vmem [shape: f32[256,128], index: 3, kind: output, shape index: {}]  }
   0x1   :  { %1793 = sst [smem:[#allocation4_spill]] %s1789_s0  ;;  %s1557_s14 = smov 0  }
   0x2   :  { %1794 = sst [smem:[#allocation5_spill]] %s1790_s1  ;;  %s1559_s15 = smov 0  }
   0x3   :  { %s1561_s16 = smov 0   ;;  %s1563_s17 = smov 0  }
   0x4   :  { %s1565_s18 = smov 0  }
   0x5 LB: > { %s25_s19 = sadd.s32 1, %s1519_s15  ;;  %s28_s20 = sadd.s32 1, %s1523_s16  ;;  %s1531_s18 = sphi %s1565_s18, %s13_s18   ;;  %s1527_s17 = sphi %s1563_s17, %s1804_s17   ;;  %s1523_s16 = sphi %s1561_s16, %s1803_s16   ;;  %s1519_s15 = sphi %s1559_s15, %s1802_s15   ;;  %s1515_s14 = sphi %s1557_s14, %s1801_s14   ;;  %s1511_s13 = sphi %s1555_s13, %s1800_s13   ;;  %s1507_s12 = sphi %s1553_s12, %s1799_s12  }
   0x6   : > { %p26_p0 = scmp.ge.s32.totalorder %s25_s19, 2  ;;  %p1141_p1 = scmp.ge.s32.totalorder %s1531_s18, 1 }
   0x7   : > { %p192_p2 = scmp.lt.s32.totalorder %s1531_s18, 17  ;;  %s32_s21 = sadd.s32 1, %s1527_s17 }
   0x8   : > { %s1806_s19 = smov (%p26_p0, %s25_s19), 0  ;;  %s1808_s20 = smov (!%p26_p0, %s28_s20), %s1523_s16 }
   0x9   : > { %p193_p3 = pnand %p1141_p1, %p192_p2  ;;  %p30_p4 = scmp.ge.s32.totalorder %s1808_s20, 2 }
   0xa   : > { %s1142_s22 = sshll.u32 (!%p193_p3), %s1511_s13, 4  ;;  %p235_p6 = scmp.lt.s32.totalorder (!%p193_p3), %s1515_s14, 1 }
   0xb   : > { %s1810_s20 = smov (%p30_p4, %s1808_s20), 0  ;;  %s1812_s21 = smov (!%p30_p4, %s32_s21), %s1527_s17 }
   0xc   : > { %p34_p5 = scmp.ge.s32.totalorder %s1812_s21, 4  ;;  %196 = sbr.rel (%p193_p3) target bundleno = 596 (0x254), region = 32 }
   0xd   : > { %p230_p7 = scmp.lt.s32.totalorder (!%p193_p3), %s1142_s22, 31  ;;  %s1146_s23 = sadd.s32 (!%p193_p3), 4294967294, %s1515_s14 }
   0xe   : > { %s1814_s21 = smov (%p34_p5, %s1812_s21), 0  ;;  %p250_p8 = scmp.gt.s32.totalorder (!%p193_p3), %s1146_s23, 0 }
   0xf   : > { %s1795_s0 = sld [smem:[#allocation4_spill]] (!%p193_p3)  ;;  %s266_s7 = sadd.s32 (!%p193_p3), 1, %s1515_s14 }
  0x10   : > { %p267_p10 = scmp.lt.s32.totalorder (!%p193_p3), %s266_s7, 0  ;;  %s268_s10 = ssub.s32 (!%p193_p3), 0, %s266_s7 }
  0x11   : > { %s236_s24 = scalar_select %p235_p6, %s1515_s14, 1 }
  0x12   : > { %s1816_s22 = smov (!%p230_p7, %s1142_s22), 31  ;;  %s1818_s23 = smov (!%p250_p8, %s1146_s23), 0 }
  0x13   : > { %s237_s25 = ssub.s32 1, %s236_s24  ;;  %s1143_s26 = sshll.u32 %s1816_s22, 3 }
  0x14   : > { %s238_s27 = smul.u32 %s1507_s12, %s237_s25  ;;  %s1796_s1 = sld [smem:[#allocation5_spill]] }
  0x15   : > { %s1609_s30 = scalar_lea.vmem %s1795_s0, %s1143_s26  ;;  %s252_s8 = smul.u32 %s1511_s13, %s1818_s23 }
  0x16   : > { %s1144_s5 = sshll.u32 %s238_s27, 4  ;;  %s1151_s26 = smin.u32 %s268_s10, %s266_s7 }
  0x17   : > { %p240_p9 = scmp.lt.s32.totalorder %s1144_s5, 31  ;;  %s1147_s25 = sshll.u32 %s252_s8, 4 }
  0x18   : > { %p254_p11 = scmp.lt.s32.totalorder %s1147_s25, 31  ;;  %s270_s27 = sand.u32 1, %s1151_s26  }
  0x19   : > { %s1820_s5 = smov (!%p240_p9, %s1144_s5), 31  ;;  %p273_p12 = scmp.lt.s32.totalorder %s1515_s14, 0 }
  0x1a   : > { %s1145_s9 = sshll.u32 %s1820_s5, 2  ;;  %s1822_s25 = smov (!%p254_p11, %s1147_s25), 31 }
  0x1b   : > { %s1618_s24 = scalar_lea.vmem %s1796_s1, %s1145_s9  ;;  %s271_s28 = ssub.s32 0, %s270_s27 }
  0x1c   : > { %s274_s29 = ssub.s32 0, %s1515_s14  ;;  %s1148_s4 = sshll.u32 %s1822_s25, 3 }
  0x1d   : > { %s1152_s23 = smin.u32 %s1515_s14, %s274_s29  ;;  %s1626_s0 = scalar_lea.vmem %s1792_s3, %s1148_s4 }
  0x1e   : > { %s276_s11 = sand.u32 1, %s1152_s23   ;;  %s1824_s28 = smov (!%p267_p10, %s271_s28), %s270_s27 }
  0x1f   : > { %s277_s8 = ssub.s32 0, %s276_s11  ;;  %s1153_s9 = sshll.u32 %s1511_s13, 1 }
  0x20   : > { %s1826_s8 = smov (!%p273_p12, %s277_s8), %s276_s11  ;;  %s280_s10 = sadd.s32 %s1507_s12, %s1153_s9 }
  0x21   : > { %s1213_s22 = sshll.u32 %s280_s10, 6  ;;  %p1156_p13 = scmp.ne.s32.totalorder %s1507_s12, 0 }
  0x22   : > { %s283_s25 = scalar_lea.vmem %s1791_s2, %s1213_s22 }
  0x23   : > { %v1638_v0 = vld [vmem:[%s283_s25] sm:$0xf]  ;;  %v1640_v1 = vld [vmem:[%s283_s25 + $0x4] sm:$0xf]  ;;  %v1642_v2 = vld [vmem:[%s283_s25 + $0x8] sm:$0xf] }
  0x24   : > { %v1644_v3 = vld [vmem:[%s283_s25 + $0xc] sm:$0xf]  ;;  %v1646_v4 = vld [vmem:[%s283_s25 + $0x10] sm:$0xf]  ;;  %v1648_v5 = vld [vmem:[%s283_s25 + $0x14] sm:$0xf] }
  0x25   : > { %v1650_v6 = vld [vmem:[%s283_s25 + $0x18] sm:$0xf]  ;;  %v1652_v7 = vld [vmem:[%s283_s25 + $0x1c] sm:$0xf]  ;;  %v1654_v8 = vld [vmem:[%s283_s25 + $0x20] sm:$0xf] }
  0x26   : > { %v1656_v9 = vld [vmem:[%s283_s25 + $0x24] sm:$0xf]  ;;  %v1658_v10 = vld [vmem:[%s283_s25 + $0x28] sm:$0xf]  ;;  %v1660_v11 = vld [vmem:[%s283_s25 + $0x2c] sm:$0xf] }
  0x27   : > { %v1662_v12 = vld [vmem:[%s283_s25 + $0x30] sm:$0xf]  ;;  %v1664_v13 = vld [vmem:[%s283_s25 + $0x34] sm:$0xf]  ;;  %v1666_v14 = vld [vmem:[%s283_s25 + $0x38] sm:$0xf] }
  0x28   : > { %v1668_v15 = vld [vmem:[%s283_s25 + $0x3c] sm:$0xf]  ;;  %303 = sbr.rel (%p1156_p13) target bundleno = 59 (0x3b), region = 36 }
  0x2d   : > { %v304_v16 = vld [vmem:[%s1609_s30] sm:$0xff]  ;;  %v305_v17 = vld [vmem:[%s1609_s30 + $0x8] sm:$0xff]  ;;  %v306_v18 = vld [vmem:[%s1609_s30 + $0x10] sm:$0xff] }
  0x2e   : > { %v320_v19 = vmul.f32 0.1, %v304_v16  ;;  %v321_v20 = vmul.f32 0.1, %v305_v17  ;;  %v322_v21 = vmul.f32 0.1, %v306_v18 }
  0x2f   : > { %v307_v22 = vld [vmem:[%s1609_s30 + $0x18] sm:$0xff]  ;;  %v308_v23 = vld [vmem:[%s1609_s30 + $0x20] sm:$0xff]  ;;  %v309_v24 = vld [vmem:[%s1609_s30 + $0x28] sm:$0xff] }
  0x30   : > { %336 = vst [vmem:[#allocation3 + $0x30] sm:$0xff] %v320_v19  ;;  %337 = vst [vmem:[#allocation3] sm:$0xff] %v321_v20  ;;  %v323_v25 = vmul.f32 0.1, %v307_v22  ;;  %v324_v26 = vmul.f32 0.1, %v308_v23 }
  0x31   : > { %338 = vst [vmem:[#allocation3 + $0x58] sm:$0xff] %v322_v21  ;;  %v325_v27 = vmul.f32 0.1, %v309_v24  ;;  %v310_v28 = vld [vmem:[%s1609_s30 + $0x30] sm:$0xff]  ;;  %v311_v29 = vld [vmem:[%s1609_s30 + $0x38] sm:$0xff]  ;;  %v312_v30 = vld [vmem:[%s1609_s30 + $0x40] sm:$0xff] }
  0x32   : > { %339 = vst [vmem:[#allocation3 + $0x18] sm:$0xff] %v323_v25  ;;  %340 = vst [vmem:[#allocation3 + $0x50] sm:$0xff] %v324_v26  ;;  %v326_v31 = vmul.f32 0.1, %v310_v28  ;;  %v327_v32 = vmul.f32 0.1, %v311_v29 }
  0x33   : > { %341 = vst [vmem:[#allocation3 + $0x68] sm:$0xff] %v325_v27  ;;  %v328_v33 = vmul.f32 0.1, %v312_v30  ;;  %v313_v34 = vld [vmem:[%s1609_s30 + $0x48] sm:$0xff]  ;;  %v314_v35 = vld [vmem:[%s1609_s30 + $0x50] sm:$0xff]  ;;  %v315_v36 = vld [vmem:[%s1609_s30 + $0x58] sm:$0xff] }
  0x34   : > { %342 = vst [vmem:[#allocation3 + $0x8] sm:$0xff] %v326_v31  ;;  %343 = vst [vmem:[#allocation3 + $0x48] sm:$0xff] %v327_v32  ;;  %v329_v37 = vmul.f32 0.1, %v313_v34  ;;  %v330_v38 = vmul.f32 0.1, %v314_v35 }
  0x35   : > { %344 = vst [vmem:[#allocation3 + $0x40] sm:$0xff] %v328_v33  ;;  %v331_v39 = vmul.f32 0.1, %v315_v36  ;;  %v316_v40 = vld [vmem:[%s1609_s30 + $0x60] sm:$0xff]  ;;  %v317_v41 = vld [vmem:[%s1609_s30 + $0x68] sm:$0xff]  ;;  %v318_v42 = vld [vmem:[%s1609_s30 + $0x70] sm:$0xff] }
  0x36   : > { %345 = vst [vmem:[#allocation3 + $0x20] sm:$0xff] %v329_v37  ;;  %346 = vst [vmem:[#allocation3 + $0x10] sm:$0xff] %v330_v38  ;;  %v332_v43 = vmul.f32 0.1, %v316_v40  ;;  %v333_v44 = vmul.f32 0.1, %v317_v41 }
  0x37   : > { %347 = vst [vmem:[#allocation3 + $0x38] sm:$0xff] %v331_v39  ;;  %v334_v45 = vmul.f32 0.1, %v318_v42  ;;  %v319_v46 = vld [vmem:[%s1609_s30 + $0x78] sm:$0xff] }
  0x38   : > { %348 = vst [vmem:[#allocation3 + $0x60] sm:$0xff] %v332_v43  ;;  %349 = vst [vmem:[#allocation3 + $0x70] sm:$0xff] %v333_v44  ;;  %v335_v47 = vmul.f32 0.1, %v319_v46 }
  0x39   : > { %350 = vst [vmem:[#allocation3 + $0x78] sm:$0xff] %v334_v45 }
  0x3a   : > { %351 = vst [vmem:[#allocation3 + $0x28] sm:$0xff] %v335_v47 }
  0x3b PF: > { %p1157_p0 = scmp.ne.s32.totalorder %s1515_s14, 0 }
  0x3d   : > { %355 = sbr.rel (%p1157_p0) target bundleno = 309 (0x135), region = 40 }
  0x42   : > { %v1461_v48 = vld [vmem:[%s1618_s24 + $0x38] sm:$0xff]   ;;  %v1462_v49 = vld [vmem:[%s1618_s24 + $0x30] sm:$0xff]   ;;  %v1158_v50 = vcombine.low %v1638_v0, %v1640_v1  ;;  %v1162_v51 = vcombine.low %v1654_v8, %v1656_v9  ;;  %v1463_v52 = vld [vmem:[%s1618_s24 + $0x28] sm:$0xff]   ;;  %v1159_v58 = vcombine.low %v1642_v2, %v1644_v3  ;;  %v1163_v59 = vcombine.low %v1658_v10, %v1660_v11 }
  0x43   : > { %1309 = vmatprep.subr.bf16.mxu0 %v1461_v48  ;;  %1373 = vmatprep.subr.bf16.mxu1 %v1461_v48  ;;  %v1464_v53 = vld [vmem:[%s1618_s24 + $0x20] sm:$0xff]   ;;  %v1465_v54 = vld [vmem:[%s1618_s24 + $0x18] sm:$0xff]   ;;  %v1466_v55 = vld [vmem:[%s1618_s24 + $0x10] sm:$0xff]   ;;  %v1160_v60 = vcombine.low %v1646_v4, %v1648_v5  ;;  %v1164_v61 = vcombine.low %v1662_v12, %v1664_v13  ;;  %v1161_v62 = vcombine.low %v1650_v6, %v1652_v7 }
  0x44   : > { %1310 = vmatpush3.bf16.msra.mxu0 %v1461_v48  ;;  %1381 = vmatpush3.bf16.msra.mxu1 %v1461_v48  ;;  %v1467_v56 = vld [vmem:[%s1618_s24 + $0x8] sm:$0xff]   ;;  %v1468_v57 = vld [vmem:[%s1618_s24] sm:$0xff]   ;;  %v1165_v63 = vcombine.low %v1666_v14, %v1668_v15  ;;  %v358_v16 = vld [vmem:[#allocation3 + $0x58] sm:$0xff] }
  0x45   : > { %1311 = vmatprep.subr.bf16.mxu0 %v1462_v49  ;;  %1374 = vmatprep.subr.bf16.mxu1 %v1462_v49  ;;  %v366_v17 = vld [vmem:[#allocation3 + $0x10] sm:$0xff]  ;;  %v364_v21 = vld [vmem:[#allocation3 + $0x40] sm:$0xff]  ;;  %v359_v26 = vld [vmem:[#allocation3 + $0x18] sm:$0xff] }
  0x46   : > { %1325 = vmatprep.mubr.bf16.mxu0 %v1158_v50  ;;  %1333 = vmatprep.mubr.bf16.mxu1 %v1162_v51  ;;  %v356_v20 = vld [vmem:[#allocation3 + $0x30] sm:$0xff]  ;;  %v367_v27 = vld [vmem:[#allocation3 + $0x38] sm:$0xff]  ;;  %v357_v32 = vld [vmem:[#allocation3] sm:$0xff] }
  0x47   : > { %v365_v33 = vld [vmem:[#allocation3 + $0x20] sm:$0xff]  ;;  %v362_v38 = vld [vmem:[#allocation3 + $0x8] sm:$0xff]  ;;  %v370_v39 = vld [vmem:[#allocation3 + $0x78] sm:$0xff] }
  0x48   : > { %1312 = vmatpush3.bf16.msra.mxu0 %v1462_v49  ;;  %1382 = vmatpush3.bf16.msra.mxu1 %v1462_v49  ;;  %v360_v44 = vld [vmem:[#allocation3 + $0x50] sm:$0xff]  ;;  %v368_v45 = vld [vmem:[#allocation3 + $0x60] sm:$0xff]  ;;  %v363_v50 = vld [vmem:[#allocation3 + $0x48] sm:$0xff] }
  0x49   : > { %1313 = vmatprep.subr.bf16.mxu0 %v1463_v52  ;;  %1375 = vmatprep.subr.bf16.mxu1 %v1463_v52  ;;  %v371_v51 = vld [vmem:[#allocation3 + $0x28] sm:$0xff] }
  0x4c   : > { %1314 = vmatpush3.bf16.msra.mxu0 %v1463_v52  ;;  %1383 = vmatpush3.bf16.msra.mxu1 %v1463_v52 }
  0x4d   : > { %1315 = vmatprep.subr.bf16.mxu0 %v1464_v53  ;;  %1376 = vmatprep.subr.bf16.mxu1 %v1464_v53 }
  0x50   : > { %1316 = vmatpush3.bf16.msra.mxu0 %v1464_v53  ;;  %1384 = vmatpush3.bf16.msra.mxu1 %v1464_v53 }
  0x51   : > { %1317 = vmatprep.subr.bf16.mxu0 %v1465_v54  ;;  %1377 = vmatprep.subr.bf16.mxu1 %v1465_v54 }
  0x54   : > { %1318 = vmatpush3.bf16.msra.mxu0 %v1465_v54  ;;  %1385 = vmatpush3.bf16.msra.mxu1 %v1465_v54 }
  0x55   : > { %1319 = vmatprep.subr.bf16.mxu0 %v1466_v55  ;;  %1378 = vmatprep.subr.bf16.mxu1 %v1466_v55 }
  0x58   : > { %1320 = vmatpush3.bf16.msra.mxu0 %v1466_v55  ;;  %1386 = vmatpush3.bf16.msra.mxu1 %v1466_v55 }
  0x59   : > { %1321 = vmatprep.subr.bf16.mxu0 %v1467_v56  ;;  %1379 = vmatprep.subr.bf16.mxu1 %v1467_v56 }
  0x5c   : > { %1322 = vmatpush3.bf16.msra.mxu0 %v1467_v56  ;;  %1387 = vmatpush3.bf16.msra.mxu1 %v1467_v56  ;;  %v361_v56 = vld [vmem:[#allocation3 + $0x68] sm:$0xff] }
  0x5d   : > { %1323 = vmatprep.subr.bf16.mxu0 %v1468_v57  ;;  %1380 = vmatprep.subr.bf16.mxu1 %v1468_v57 }
  0x60   : > { %1324 = vmatpush3.bf16.msra.mxu0 %v1468_v57  ;;  %1388 = vmatpush3.bf16.msra.mxu1 %v1468_v57  ;;  %v369_v57 = vld [vmem:[#allocation3 + $0x70] sm:$0xff] }
  0x63   : > { %1326 = vmatmul.mubr.bf16.vlgmr.msra.gmra.mxu0 %v1159_v58  ;;  %1334 = vmatmul.mubr.bf16.vlgmr.msra.gmra.mxu1 %v1163_v59 }
  0x64   : > { %1329 = vmatprep.mubr.bf16.mxu0 %v1160_v60  ;;  %1337 = vmatprep.mubr.bf16.mxu1 %v1164_v61 }
  0x6b   : > { %1330 = vmatmul.mubr.bf16.gmra.mxu0 %v1161_v62  ;;  %1338 = vmatmul.mubr.bf16.gmra.mxu1 %v1165_v63 }
 0x123   : > { %v1327_v18 = vpop.f32.mrf.mxu0  ;;  %v1335_v19 = vpop.f32.mrf.mxu1 }
 0x124   : > { %v583_v22 = vadd.f32 %v1327_v18, %v358_v16  ;;  %v591_v23 = vadd.f32 %v1335_v19, %v366_v17 }
 0x125   : > { %v518_v24 = vpop.f32.mrf.mxu0  ;;  %v550_v25 = vpop.f32.mrf.mxu1 }
 0x126   : > { %599 = vst [vmem:[#allocation3 + $0x58] sm:$0xff] %v583_v22  ;;  %607 = vst [vmem:[#allocation3 + $0x10] sm:$0xff] %v591_v23  ;;  %v581_v28 = vadd.f32 %v518_v24, %v356_v20  ;;  %v589_v29 = vadd.f32 %v550_v25, %v364_v21 }
 0x127   : > { %v1328_v30 = vpop.f32.mrf.mxu0  ;;  %v1336_v31 = vpop.f32.mrf.mxu1 }
 0x128   : > { %597 = vst [vmem:[#allocation3 + $0x30] sm:$0xff] %v581_v28  ;;  %605 = vst [vmem:[#allocation3 + $0x40] sm:$0xff] %v589_v29  ;;  %v584_v34 = vadd.f32 %v1328_v30, %v359_v26  ;;  %v592_v35 = vadd.f32 %v1336_v31, %v367_v27 }
 0x129   : > { %v521_v36 = vpop.f32.mrf.mxu0  ;;  %v553_v37 = vpop.f32.mrf.mxu1 }
 0x12a   : > { %600 = vst [vmem:[#allocation3 + $0x18] sm:$0xff] %v584_v34  ;;  %608 = vst [vmem:[#allocation3 + $0x38] sm:$0xff] %v592_v35  ;;  %v582_v40 = vadd.f32 %v521_v36, %v357_v32  ;;  %v590_v41 = vadd.f32 %v553_v37, %v365_v33 }
 0x12b   : > { %v1331_v42 = vpop.f32.mrf.mxu0  ;;  %v1339_v43 = vpop.f32.mrf.mxu1 }
 0x12c   : > { %598 = vst [vmem:[#allocation3] sm:$0xff] %v582_v40  ;;  %606 = vst [vmem:[#allocation3 + $0x20] sm:$0xff] %v590_v41  ;;  %v587_v46 = vadd.f32 %v1331_v42, %v362_v38  ;;  %v595_v47 = vadd.f32 %v1339_v43, %v370_v39 }
 0x12d   : > { %v534_v48 = vpop.f32.mrf.mxu0  ;;  %v566_v49 = vpop.f32.mrf.mxu1 }
 0x12e   : > { %603 = vst [vmem:[#allocation3 + $0x8] sm:$0xff] %v587_v46  ;;  %611 = vst [vmem:[#allocation3 + $0x78] sm:$0xff] %v595_v47  ;;  %v585_v52 = vadd.f32 %v534_v48, %v360_v44  ;;  %v593_v53 = vadd.f32 %v566_v49, %v368_v45 }
 0x12f   : > { %v1332_v54 = vpop.f32.mrf.mxu0  ;;  %v1340_v55 = vpop.f32.mrf.mxu1 }
 0x130   : > { %601 = vst [vmem:[#allocation3 + $0x50] sm:$0xff] %v585_v52  ;;  %609 = vst [vmem:[#allocation3 + $0x60] sm:$0xff] %v593_v53  ;;  %v588_v58 = vadd.f32 %v1332_v54, %v363_v50  ;;  %v596_v59 = vadd.f32 %v1340_v55, %v371_v51 }
 0x131   : > { %v537_v60 = vpop.f32.mrf.mxu0  ;;  %v569_v61 = vpop.f32.mrf.mxu1 }
 0x132   : > { %604 = vst [vmem:[#allocation3 + $0x48] sm:$0xff] %v588_v58  ;;  %612 = vst [vmem:[#allocation3 + $0x28] sm:$0xff] %v596_v59  ;;  %v586_v62 = vadd.f32 %v537_v60, %v361_v56  ;;  %v594_v63 = vadd.f32 %v569_v61, %v369_v57 }
 0x134   : > { %602 = vst [vmem:[#allocation3 + $0x68] sm:$0xff] %v586_v62  ;;  %610 = vst [vmem:[#allocation3 + $0x70] sm:$0xff] %v594_v63 }
 0x135 PF: > { %p1174_p1 = scmp.le.s32.totalorder %s1515_s14, 0 }
 0x136   : > { %s1797_s1 = sshll.u32 (!%p1174_p1), %s1507_s12, 7  ;;  %s1175_s4 = sshll.u32 (!%p1174_p1), %s1824_s28, 5 }
 0x137   : > { %616 = sbr.rel (%p1174_p1) target bundleno = 560 (0x230), region = 44  ;;  %s617_s30 = sshra.s32 (!%p1174_p1), %s1797_s1, 3 }
 0x138   : > { %s620_s6 = sadd.s32 (!%p1174_p1), %s1175_s4, %s617_s30 }
 0x139   : > { %s1176_s7 = sshll.u32 (!%p1174_p1), %s620_s6, 2 }
 0x13a   : > { %s1720_s24 = scalar_lea.vmem (!%p1174_p1), [#allocation2], %s1176_s7 }
 0x13c   : > { %v1177_v16 = vcombine.low %v1638_v0, %v1640_v1  ;;  %v1181_v17 = vcombine.low %v1654_v8, %v1656_v9  ;;  %v1469_v18 = vld [vmem:[%s1720_s24 + $0x38] sm:$0xff]   ;;  %v1470_v19 = vld [vmem:[%s1720_s24 + $0x30] sm:$0xff]   ;;  %v1471_v0 = vld [vmem:[%s1720_s24 + $0x28] sm:$0xff]   ;;  %v1178_v22 = vcombine.low %v1642_v2, %v1644_v3  ;;  %v1182_v23 = vcombine.low %v1658_v10, %v1660_v11 }
 0x13d   : > { %1341 = vmatprep.subr.bf16.mxu0 %v1469_v18  ;;  %1389 = vmatprep.subr.bf16.mxu1 %v1469_v18  ;;  %v1472_v1 = vld [vmem:[%s1720_s24 + $0x20] sm:$0xff]   ;;  %v1473_v8 = vld [vmem:[%s1720_s24 + $0x18] sm:$0xff]   ;;  %v1474_v9 = vld [vmem:[%s1720_s24 + $0x10] sm:$0xff]   ;;  %v1179_v24 = vcombine.low %v1646_v4, %v1648_v5  ;;  %v1183_v25 = vcombine.low %v1662_v12, %v1664_v13  ;;  %v1180_v26 = vcombine.low %v1650_v6, %v1652_v7 }
 0x13e   : > { %1357 = vmatprep.mubr.bf16.mxu0 %v1177_v16  ;;  %1365 = vmatprep.mubr.bf16.mxu1 %v1181_v17  ;;  %v1475_v20 = vld [vmem:[%s1720_s24 + $0x8] sm:$0xff]   ;;  %v1476_v21 = vld [vmem:[%s1720_s24] sm:$0xff]   ;;  %v1184_v2 = vcombine.low %v1666_v14, %v1668_v15  ;;  %v641_v3 = vld [vmem:[#allocation3 + $0x58] sm:$0xff] }
 0x13f   : > { %1342 = vmatpush3.bf16.msra.mxu0 %v1469_v18  ;;  %1397 = vmatpush3.bf16.msra.mxu1 %v1469_v18  ;;  %v649_v10 = vld [vmem:[#allocation3 + $0x10] sm:$0xff]  ;;  %v647_v5 = vld [vmem:[#allocation3 + $0x40] sm:$0xff]  ;;  %v642_v30 = vld [vmem:[#allocation3 + $0x18] sm:$0xff] }
 0x140   : > { %1343 = vmatprep.subr.bf16.mxu0 %v1470_v19  ;;  %1390 = vmatprep.subr.bf16.mxu1 %v1470_v19  ;;  %v639_v4 = vld [vmem:[#allocation3 + $0x30] sm:$0xff]  ;;  %v650_v31 = vld [vmem:[#allocation3 + $0x38] sm:$0xff]  ;;  %v640_v15 = vld [vmem:[#allocation3] sm:$0xff] }
 0x141   : > { %v648_v33 = vld [vmem:[#allocation3 + $0x20] sm:$0xff]  ;;  %v645_v38 = vld [vmem:[#allocation3 + $0x8] sm:$0xff]  ;;  %v653_v39 = vld [vmem:[#allocation3 + $0x78] sm:$0xff] }
 0x142   : > { %v643_v44 = vld [vmem:[#allocation3 + $0x50] sm:$0xff]  ;;  %v651_v45 = vld [vmem:[#allocation3 + $0x60] sm:$0xff]  ;;  %v646_v50 = vld [vmem:[#allocation3 + $0x48] sm:$0xff] }
 0x143   : > { %1344 = vmatpush3.bf16.msra.mxu0 %v1470_v19  ;;  %1398 = vmatpush3.bf16.msra.mxu1 %v1470_v19  ;;  %v654_v51 = vld [vmem:[#allocation3 + $0x28] sm:$0xff]  ;;  %v652_v57 = vld [vmem:[#allocation3 + $0x70] sm:$0xff] }
 0x144   : > { %1345 = vmatprep.subr.bf16.mxu0 %v1471_v0  ;;  %1391 = vmatprep.subr.bf16.mxu1 %v1471_v0  ;;  %v644_v56 = vld [vmem:[#allocation3 + $0x68] sm:$0xff] }
 0x147   : > { %1346 = vmatpush3.bf16.msra.mxu0 %v1471_v0  ;;  %1399 = vmatpush3.bf16.msra.mxu1 %v1471_v0 }
 0x148   : > { %1347 = vmatprep.subr.bf16.mxu0 %v1472_v1  ;;  %1392 = vmatprep.subr.bf16.mxu1 %v1472_v1 }
 0x14b   : > { %1348 = vmatpush3.bf16.msra.mxu0 %v1472_v1  ;;  %1400 = vmatpush3.bf16.msra.mxu1 %v1472_v1 }
 0x14c   : > { %1349 = vmatprep.subr.bf16.mxu0 %v1473_v8  ;;  %1393 = vmatprep.subr.bf16.mxu1 %v1473_v8 }
 0x14f   : > { %1350 = vmatpush3.bf16.msra.mxu0 %v1473_v8  ;;  %1401 = vmatpush3.bf16.msra.mxu1 %v1473_v8 }
 0x150   : > { %1351 = vmatprep.subr.bf16.mxu0 %v1474_v9  ;;  %1394 = vmatprep.subr.bf16.mxu1 %v1474_v9 }
 0x153   : > { %1352 = vmatpush3.bf16.msra.mxu0 %v1474_v9  ;;  %1402 = vmatpush3.bf16.msra.mxu1 %v1474_v9 }
 0x154   : > { %1353 = vmatprep.subr.bf16.mxu0 %v1475_v20  ;;  %1395 = vmatprep.subr.bf16.mxu1 %v1475_v20 }
 0x157   : > { %1354 = vmatpush3.bf16.msra.mxu0 %v1475_v20  ;;  %1403 = vmatpush3.bf16.msra.mxu1 %v1475_v20 }
 0x158   : > { %1355 = vmatprep.subr.bf16.mxu0 %v1476_v21  ;;  %1396 = vmatprep.subr.bf16.mxu1 %v1476_v21 }
 0x15b   : > { %1356 = vmatpush3.bf16.msra.mxu0 %v1476_v21  ;;  %1404 = vmatpush3.bf16.msra.mxu1 %v1476_v21 }
 0x15e   : > { %1358 = vmatmul.mubr.bf16.vlgmr.msra.gmra.mxu0 %v1178_v22  ;;  %1366 = vmatmul.mubr.bf16.vlgmr.msra.gmra.mxu1 %v1182_v23 }
 0x15f   : > { %1361 = vmatprep.mubr.bf16.mxu0 %v1179_v24  ;;  %1369 = vmatprep.mubr.bf16.mxu1 %v1183_v25 }
 0x166   : > { %1362 = vmatmul.mubr.bf16.gmra.mxu0 %v1180_v26  ;;  %1370 = vmatmul.mubr.bf16.gmra.mxu1 %v1184_v2 }
 0x21e   : > { %v1359_v11 = vpop.f32.mrf.mxu0  ;;  %v1367_v27 = vpop.f32.mrf.mxu1 }
 0x21f   : > { %v850_v28 = vadd.f32 %v1359_v11, %v641_v3  ;;  %v858_v12 = vadd.f32 %v1367_v27, %v649_v10 }
 0x220   : > { %v785_v13 = vpop.f32.mrf.mxu0  ;;  %v817_v29 = vpop.f32.mrf.mxu1 }
 0x221   : > { %866 = vst [vmem:[#allocation3 + $0x58] sm:$0xff] %v850_v28  ;;  %874 = vst [vmem:[#allocation3 + $0x10] sm:$0xff] %v858_v12  ;;  %v848_v6 = vadd.f32 %v785_v13, %v639_v4  ;;  %v856_v7 = vadd.f32 %v817_v29, %v647_v5 }
 0x222   : > { %v1360_v32 = vpop.f32.mrf.mxu0  ;;  %v1368_v14 = vpop.f32.mrf.mxu1 }
 0x223   : > { %864 = vst [vmem:[#allocation3 + $0x30] sm:$0xff] %v848_v6  ;;  %872 = vst [vmem:[#allocation3 + $0x40] sm:$0xff] %v856_v7  ;;  %v851_v34 = vadd.f32 %v1360_v32, %v642_v30  ;;  %v859_v35 = vadd.f32 %v1368_v14, %v650_v31 }
 0x224   : > { %v788_v36 = vpop.f32.mrf.mxu0  ;;  %v820_v37 = vpop.f32.mrf.mxu1 }
 0x225   : > { %867 = vst [vmem:[#allocation3 + $0x18] sm:$0xff] %v851_v34  ;;  %875 = vst [vmem:[#allocation3 + $0x38] sm:$0xff] %v859_v35  ;;  %v849_v40 = vadd.f32 %v788_v36, %v640_v15  ;;  %v857_v41 = vadd.f32 %v820_v37, %v648_v33 }
 0x226   : > { %v1363_v42 = vpop.f32.mrf.mxu0  ;;  %v1371_v43 = vpop.f32.mrf.mxu1 }
 0x227   : > { %865 = vst [vmem:[#allocation3] sm:$0xff] %v849_v40  ;;  %873 = vst [vmem:[#allocation3 + $0x20] sm:$0xff] %v857_v41  ;;  %v854_v46 = vadd.f32 %v1363_v42, %v645_v38  ;;  %v862_v47 = vadd.f32 %v1371_v43, %v653_v39 }
 0x228   : > { %v801_v48 = vpop.f32.mrf.mxu0  ;;  %v833_v49 = vpop.f32.mrf.mxu1 }
 0x229   : > { %870 = vst [vmem:[#allocation3 + $0x8] sm:$0xff] %v854_v46  ;;  %878 = vst [vmem:[#allocation3 + $0x78] sm:$0xff] %v862_v47  ;;  %v852_v52 = vadd.f32 %v801_v48, %v643_v44  ;;  %v860_v53 = vadd.f32 %v833_v49, %v651_v45 }
 0x22a   : > { %v1364_v54 = vpop.f32.mrf.mxu0  ;;  %v1372_v55 = vpop.f32.mrf.mxu1 }
 0x22b   : > { %868 = vst [vmem:[#allocation3 + $0x50] sm:$0xff] %v852_v52  ;;  %876 = vst [vmem:[#allocation3 + $0x60] sm:$0xff] %v860_v53  ;;  %v855_v58 = vadd.f32 %v1364_v54, %v646_v50  ;;  %v863_v59 = vadd.f32 %v1372_v55, %v654_v51 }
 0x22c   : > { %v804_v60 = vpop.f32.mrf.mxu0  ;;  %v836_v61 = vpop.f32.mrf.mxu1 }
 0x22d   : > { %871 = vst [vmem:[#allocation3 + $0x48] sm:$0xff] %v855_v58  ;;  %879 = vst [vmem:[#allocation3 + $0x28] sm:$0xff] %v863_v59  ;;  %v853_v62 = vadd.f32 %v804_v60, %v644_v56  ;;  %v861_v63 = vadd.f32 %v836_v61, %v652_v57 }
 0x22f   : > { %869 = vst [vmem:[#allocation3 + $0x68] sm:$0xff] %v853_v62  ;;  %877 = vst [vmem:[#allocation3 + $0x70] sm:$0xff] %v861_v63 }
 0x230 PF: > { %p880_p2 = scmp.eq.s32.totalorder %s1507_s12, 1  ;;  %p881_p3 = scmp.lt.s32.totalorder %s1515_s14, 3 }
 0x232   : > { %p882_p4 = pnand %p881_p3, %p880_p2 }
 0x233   : > { %s1798_s27 = sshll.u32 (!%p882_p4), %s1511_s13, 7  ;;  %s1209_s29 = sshll.u32 (!%p882_p4), %s1826_s8, 5 }
 0x234   : > { %885 = sbr.rel (%p882_p4) target bundleno = 578 (0x242), region = 48  ;;  %s966_s28 = sshra.s32 (!%p882_p4), %s1798_s27, 3 }
 0x235   : > { %s969_s23 = sadd.s32 (!%p882_p4), %s1209_s29, %s966_s28 }
 0x236   : > { %s1210_s5 = sshll.u32 (!%p882_p4), %s969_s23, 2 }
 0x237   : > { %s971_s11 = scalar_lea.vmem (!%p882_p4), [#allocation2], %s1210_s5 }
 0x239   : > { %v886_v16 = vld [vmem:[#allocation3 + $0x30] sm:$0xff]  ;;  %v887_v17 = vld [vmem:[#allocation3] sm:$0xff]  ;;  %v888_v18 = vld [vmem:[#allocation3 + $0x58] sm:$0xff] }
 0x23a   : > { %v1233_v19 = vpack.c.bf16 %v887_v17, %v886_v16  ;;  %v889_v0 = vld [vmem:[#allocation3 + $0x18] sm:$0xff]  ;;  %v890_v1 = vld [vmem:[#allocation3 + $0x50] sm:$0xff]  ;;  %v891_v8 = vld [vmem:[#allocation3 + $0x68] sm:$0xff] }
 0x23b   : > { %v1238_v9 = vpack.c.bf16 %v889_v0, %v888_v18  ;;  %v1243_v20 = vpack.c.bf16 %v891_v8, %v890_v1  ;;  %v892_v21 = vld [vmem:[#allocation3 + $0x8] sm:$0xff]  ;;  %v894_v23 = vld [vmem:[#allocation3 + $0x40] sm:$0xff]  ;;  %v896_v26 = vld [vmem:[#allocation3 + $0x10] sm:$0xff] }
 0x23c   : > { %v893_v22 = vld [vmem:[#allocation3 + $0x48] sm:$0xff]  ;;  %v895_v25 = vld [vmem:[#allocation3 + $0x20] sm:$0xff]  ;;  %v897_v2 = vld [vmem:[#allocation3 + $0x38] sm:$0xff]  ;;  %1234 = vst [vmem:[%s971_s11] sm:$0xff] %v1233_v19  }
 0x23d   : > { %v1248_v24 = vpack.c.bf16 %v893_v22, %v892_v21  ;;  %1270 = vst [vmem:[%s971_s11 + $0x8] sm:$0xff] %v1238_v9   ;;  %1271 = vst [vmem:[%s971_s11 + $0x10] sm:$0xff] %v1243_v20   ;;  %v1253_v3 = vpack.c.bf16 %v895_v25, %v894_v23  ;;  %v1258_v10 = vpack.c.bf16 %v897_v2, %v896_v26  ;;  %v898_v11 = vld [vmem:[#allocation3 + $0x60] sm:$0xff]  ;;  %v899_v27 = vld [vmem:[#allocation3 + $0x70] sm:$0xff] }
 0x23e   : > { %v900_v4 = vld [vmem:[#allocation3 + $0x78] sm:$0xff]  ;;  %v1263_v5 = vpack.c.bf16 %v899_v27, %v898_v11  ;;  %v901_v28 = vld [vmem:[#allocation3 + $0x28] sm:$0xff] }
 0x23f   : > { %1272 = vst [vmem:[%s971_s11 + $0x18] sm:$0xff] %v1248_v24   ;;  %1273 = vst [vmem:[%s971_s11 + $0x20] sm:$0xff] %v1253_v3   ;;  %v1268_v12 = vpack.c.bf16 %v901_v28, %v900_v4 }
 0x240   : > { %1274 = vst [vmem:[%s971_s11 + $0x28] sm:$0xff] %v1258_v10   ;;  %1275 = vst [vmem:[%s971_s11 + $0x30] sm:$0xff] %v1263_v5  }
 0x241   : > { %1276 = vst [vmem:[%s971_s11 + $0x38] sm:$0xff] %v1268_v12  }
 0x242 PF: > { %p988_p5 = scmp.eq.s32.totalorder %s1515_s14, 3 }
 0x244   : > { %p989_p6 = pnand %p988_p5, %p880_p2 }
 0x246   : > { %992 = sbr.rel (%p989_p6) target bundleno = 596 (0x254), region = 52 }
 0x24b   : > { %v993_v13 = vld [vmem:[#allocation3 + $0x30] sm:$0xff]  ;;  %v994_v29 = vld [vmem:[#allocation3] sm:$0xff]  ;;  %v995_v30 = vld [vmem:[#allocation3 + $0x58] sm:$0xff] }
 0x24c   : > { %1009 = vst [vmem:[%s1626_s0] sm:$0xff] %v993_v13  ;;  %1010 = vst [vmem:[%s1626_s0 + $0x8] sm:$0xff] %v994_v29  ;;  %v996_v31 = vld [vmem:[#allocation3 + $0x18] sm:$0xff]  ;;  %v997_v6 = vld [vmem:[#allocation3 + $0x50] sm:$0xff] }
 0x24d   : > { %1011 = vst [vmem:[%s1626_s0 + $0x10] sm:$0xff] %v995_v30  ;;  %v998_v7 = vld [vmem:[#allocation3 + $0x68] sm:$0xff]  ;;  %1012 = vst [vmem:[%s1626_s0 + $0x18] sm:$0xff] %v996_v31  ;;  %v1001_v15 = vld [vmem:[#allocation3 + $0x40] sm:$0xff] }
 0x24e   : > { %1013 = vst [vmem:[%s1626_s0 + $0x20] sm:$0xff] %v997_v6  ;;  %1014 = vst [vmem:[%s1626_s0 + $0x28] sm:$0xff] %v998_v7  ;;  %v999_v32 = vld [vmem:[#allocation3 + $0x8] sm:$0xff]  ;;  %v1002_v33 = vld [vmem:[#allocation3 + $0x20] sm:$0xff] }
 0x24f   : > { %v1000_v14 = vld [vmem:[#allocation3 + $0x48] sm:$0xff]  ;;  %1015 = vst [vmem:[%s1626_s0 + $0x30] sm:$0xff] %v999_v32  ;;  %1017 = vst [vmem:[%s1626_s0 + $0x40] sm:$0xff] %v1001_v15  ;;  %v1003_v34 = vld [vmem:[#allocation3 + $0x10] sm:$0xff] }
 0x250   : > { %1016 = vst [vmem:[%s1626_s0 + $0x38] sm:$0xff] %v1000_v14  ;;  %v1004_v35 = vld [vmem:[#allocation3 + $0x38] sm:$0xff]  ;;  %1018 = vst [vmem:[%s1626_s0 + $0x48] sm:$0xff] %v1002_v33  ;;  %v1005_v36 = vld [vmem:[#allocation3 + $0x60] sm:$0xff] }
 0x251   : > { %1019 = vst [vmem:[%s1626_s0 + $0x50] sm:$0xff] %v1003_v34  ;;  %1020 = vst [vmem:[%s1626_s0 + $0x58] sm:$0xff] %v1004_v35  ;;  %v1006_v37 = vld [vmem:[#allocation3 + $0x70] sm:$0xff]  ;;  %v1007_v38 = vld [vmem:[#allocation3 + $0x78] sm:$0xff] }
 0x252   : > { %1021 = vst [vmem:[%s1626_s0 + $0x60] sm:$0xff] %v1005_v36  ;;  %1022 = vst [vmem:[%s1626_s0 + $0x68] sm:$0xff] %v1006_v37  ;;  %v1008_v39 = vld [vmem:[#allocation3 + $0x28] sm:$0xff] }
 0x253   : > { %1023 = vst [vmem:[%s1626_s0 + $0x70] sm:$0xff] %v1007_v38  ;;  %1024 = vst [vmem:[%s1626_s0 + $0x78] sm:$0xff] %v1008_v39 }
 0x254 PF: > { %s13_s18 = sadd.s32 1, %s1531_s18   ;;  %s1799_s12 = smov %s1519_s15 }
 0x255   : > { %p10_p7 = scmp.ge.s32.totalorder %s13_s18, 18   ;;  %s1800_s13 = smov %s1523_s16 }
 0x256   : > { %s1801_s14 = smov %s1527_s17  ;;  %s1802_s15 = smov %s1806_s19 }
 0x257   : > { %s1803_s16 = smov %s1810_s20  ;;  %s1804_s17 = smov %s1814_s21 }
 0x258   :  { %12 = sbr.rel (!%p10_p7) target bundleno = 5 (0x5), region = 88 }

</bundles_post_ra>
